<compile_context>
chip_gen: v7x
topology: tpu7x:2x2x1
jax: 0.10.0
libtpu: 0.0.40
codegen_flags: <defaults>
</compile_context>

<pallas_src>
import functools

import jax
import jax.numpy as jnp
from jax import lax
from jax.experimental import pallas as pl
from jax.experimental.pallas import tpu as pltpu


def _ce_kernel(x_ref, t_ref, out_ref, *, eps, n_classes, n_valid, tile_m,
               blocks_per_core, blocks_total, mask_needed):
    c = pl.program_id(0)            # core-split axis ("parallel", v7x only)
    i = pl.program_id(1)            # row-tile axis  ("arbitrary")

    # The (1,1,1) output block is resident across the i axis -> use it directly
    # as the running accumulator (no (tile_m,1) VMEM scratch round-trip).
    @pl.when(i == 0)
    def _init():
        out_ref[...] = jnp.zeros_like(out_ref)

    x = x_ref[...].astype(jnp.float32)               # (tile_m, C), math in f32
    t = t_ref[...]                                   # (tile_m, 1) int32

    ones_c = jnp.ones((n_classes, 1), jnp.float32)   # lane-padded by Mosaic

    # Row max is the only cross-lane (XLU) reduce left.
    m = jnp.max(x, axis=-1, keepdims=True)           # (tile_m, 1)
    # min(.,0) is a no-op for valid lanes (x <= m per row) but keeps exp() of
    # any lane-padding garbage finite before it reaches the MXU contraction.
    e = jnp.exp(jnp.minimum(x - m, 0.0))             # EUP
    # Class-axis sums on the MXU via a ones column (frees the XLU).
    sexp = jnp.dot(e, ones_c, precision=lax.Precision.HIGHEST,
                   preferred_element_type=jnp.float32)            # (tile_m, 1)
    # Per-row log is lane-sparse EUP work; accepted as the floor (see review).
    lse = m + jnp.log(sexp)

    # sum_c x[c]*((1-eps)*onehot[c] + eps/C) == (1-eps)*x[y] + (eps/C)*sum_c x[c]
    classes = lax.broadcasted_iota(jnp.int32, x.shape, 1)
    w = jnp.where(classes == t, (1.0 - eps) + eps / n_classes, eps / n_classes)
    sw = jnp.dot(x * w, ones_c, precision=lax.Precision.HIGHEST,
                 preferred_element_type=jnp.float32)              # (tile_m, 1)

    per_row = lse - sw                                # (tile_m, 1)

    def _accumulate(rows):
        # Single sublane fold -> scalar, accumulated into the resident output.
        out_ref[...] += jnp.sum(rows, axis=0, keepdims=True).reshape(1, 1, 1)

    if not mask_needed:                 # static: shapes divide evenly
        _accumulate(per_row)
    else:
        # Only the last real block (ragged) and clamped out-of-work blocks need
        # masking; interior blocks skip the iota/where entirely.  Mask with the
        # UNCLAMPED global block index (keeps the clamped re-read safe) and a
        # select (not multiply) so NaN/Inf garbage rows are dropped cleanly.
        global_block = c * blocks_per_core + i
        is_edge = global_block >= blocks_total - 1

        @pl.when(jnp.logical_not(is_edge))
        def _interior():
            _accumulate(per_row)

        @pl.when(is_edge)
        def _edge():
            row = global_block * tile_m + lax.broadcasted_iota(
                jnp.int32, (tile_m, 1), 0)
            _accumulate(jnp.where(row < n_valid, per_row, 0.0))


def _default_num_cores():
    # 2 TensorCores per chip only on v7x-class parts; 1 on v5e / v6e.
    try:
        kind = jax.devices()[0].device_kind.lower()
    except Exception:
        return 1
    return 2 if ("v7" in kind or "tpu7" in kind) else 1


def cross_entropy_loss(logits_nhwc, target_nhw, *, label_smoothing=0.1,
                       tile_m=4096, num_cores=None):
    """logits_nhwc: (N, H, W, C) f32/bf16, target_nhw: (N, H, W) int -> scalar f32."""
    N, H, W, C = logits_nhwc.shape
    M = N * H * W
    x = logits_nhwc.reshape(M, C)                    # free reshape, no HBM copy
    t = target_nhw.reshape(M, 1).astype(jnp.int32)

    if num_cores is None:
        num_cores = _default_num_cores()

    # Block row count must be a multiple of the sublane tiling of the logits
    # dtype (8 for f32, 16 for bf16); clamp to the array size so tiny inputs do
    # not allocate oversized VMEM buffers.
    itemsize = jnp.dtype(x.dtype).itemsize
    sub = max(8, 32 // itemsize)
    m_round = pl.cdiv(M, sub) * sub
    tile_m = max(sub, min(tile_m, m_round))
    tile_m = pl.cdiv(tile_m, sub) * sub

    blocks_total = pl.cdiv(M, tile_m)
    n_par = num_cores if blocks_total >= num_cores else 1
    blocks_per_core = pl.cdiv(blocks_total, n_par)
    # True iff a ragged last block or a clamped out-of-work block exists.
    mask_needed = (n_par * blocks_per_core * tile_m) != M

    # Clamp the block index so out-of-work iterations (odd block counts with a
    # 2-way split) re-read a valid block; the kernel masks them to zero via the
    # unclamped global row index.
    def row_map(c, i):
        return (jnp.minimum(c * blocks_per_core + i, blocks_total - 1), 0)

    kernel = functools.partial(
        _ce_kernel, eps=float(label_smoothing), n_classes=C, n_valid=M,
        tile_m=tile_m, blocks_per_core=blocks_per_core,
        blocks_total=blocks_total, mask_needed=mask_needed)

    cost = pl.CostEstimate(
        flops=10 * M * C,                    # 2 ones-matmuls + elementwise
        transcendentals=M * (C + 1),         # exp per element + log per row
        bytes_accessed=M * C * itemsize + M * 4 + n_par * 4,
    )

    # VMEM budget: both input blocks pad to 128 lanes (the (tile_m,1) int32
    # target block pads to (tile_m,128)); double-buffered by the pipeline.
    # Cap below v7x's 64 MiB physical VMEM.
    lane_pad = 128
    padded_c = pl.cdiv(C, lane_pad) * lane_pad
    vmem_need = 2 * tile_m * padded_c * itemsize + 2 * tile_m * lane_pad * 4
    vmem_limit = int(min(max(2 * vmem_need, 16 << 20), 48 << 20))

    partial_sums = pl.pallas_call(
        kernel,
        out_shape=jax.ShapeDtypeStruct((n_par, 1, 1), jnp.float32),
        grid_spec=pltpu.PrefetchScalarGridSpec(
            num_scalar_prefetch=0,
            grid=(n_par, blocks_per_core),
            in_specs=[
                pl.BlockSpec((tile_m, C), row_map),
                pl.BlockSpec((tile_m, 1), row_map),
            ],
            out_specs=pl.BlockSpec((1, 1, 1), lambda c, i: (c, 0, 0)),
        ),
        compiler_params=pltpu.CompilerParams(
            dimension_semantics=("parallel", "arbitrary"),
            vmem_limit_bytes=vmem_limit),
        cost_estimate=cost,
    )(x, t)

    # reduction='mean'; final sum of the n_par partials done in plain JAX.
    return jnp.sum(partial_sums) / M


def _reference_loss(logits_nhwc, target_nhw, label_smoothing=0.1):
    """Pure-JAX reference of PyTorch CE with label smoothing, reduction='mean'."""
    N, H, W, C = logits_nhwc.shape
    x = logits_nhwc.reshape(-1, C).astype(jnp.float32)
    y = target_nhw.reshape(-1)
    lse = jax.scipy.special.logsumexp(x, axis=-1)
    tgt = jnp.take_along_axis(x, y[:, None], axis=-1)[:, 0]
    loss = lse - (1.0 - label_smoothing) * tgt - (label_smoothing / C) * jnp.sum(x, axis=-1)
    return jnp.mean(loss)


if __name__ == "__main__":
    # Module config: n_bins=100 classes, label_smoothing=0.1.
    n_bins = 100
    label_smoothing = 0.1
    range_min, range_max = -3.5, 3.5
    bin_area = (range_max - range_min) / n_bins
    bin_borders = jnp.linspace(range_min + bin_area, range_max - bin_area, n_bins - 1)

    base_key = jax.random.PRNGKey(0)

    def run_case(N, H, W, tile_m, dtype, num_cores=None, tol=1e-5):
        k1, k2 = jax.random.split(jax.random.fold_in(base_key, N * 10000 + H * 100 + W))
        logits = jax.random.normal(k1, (N, H, W, n_bins), dtype=jnp.float32).astype(dtype)
        # Targets built the way prepare_target would (bucketize a continuous value).
        cont = jax.random.uniform(k2, (N, H, W), minval=range_min, maxval=range_max)
        target = jnp.searchsorted(bin_borders, cont).astype(jnp.int32)
        loss = cross_entropy_loss(logits, target, label_smoothing=label_smoothing,
                                  tile_m=tile_m, num_cores=num_cores)
        loss = jax.block_until_ready(loss)
        ref = _reference_loss(logits, target, label_smoothing)
        assert jnp.allclose(loss, ref, rtol=tol, atol=tol), (
            N, H, W, tile_m, str(dtype), num_cores, loss, ref)

    # Single-block path (clamped tile, no masking), auto core count, f32 logits.
    run_case(2, 8, 8, 4096, jnp.float32)
    # Multi-block ragged path with a forced 2-way core split (odd block count
    # exercises the clamped-block masking), f32 logits.
    run_case(2, 9, 9, 64, jnp.float32, num_cores=2)
    # bf16 logits (half the HBM traffic; kernel upcasts to f32 internally),
    # 16-row sublane tiling, ragged last block, auto core count.
    run_case(2, 9, 8, 128, jnp.bfloat16)

    # TODO(synk): prepare_target / output_to_mean / output_to_std are host-side
    # helpers (bucketize / softmax moments), not part of forward(); not kernelized.
    print("KERNEL_OK")
</pallas_src>

<mosaic_0001>
module attributes {stable_mosaic.version = 11 : i64} {
  func.func @_ce_kernel(%arg0: i32, %arg1: i32, %arg2: memref<128x100xf32, #tpu.memory_space<vmem>>, %arg3: memref<128x1xi32, #tpu.memory_space<vmem>>, %arg4: memref<1x1x1xf32, #tpu.memory_space<vmem>>) attributes {dimension_semantics = [#tpu.dimension_semantics<parallel>, #tpu.dimension_semantics<arbitrary>], iteration_bounds = array<i64: 1, 1>, scalar_prefetch = 0 : i64, scratch_operands = 0 : i64, tpu.core_type = #tpu.core_type<tc>, window_params = [{transform_indices = @transform_0, window_bounds = array<i64: 128, 100>}, {transform_indices = @transform_1, window_bounds = array<i64: 128, 1>}, {transform_indices = @transform_2, window_bounds = array<i64: 1, 1, 1>}]} {
    %c0_i32 = arith.constant 0 : i32
    %0 = arith.cmpi eq, %arg1, %c0_i32 : i32
    %1 = arith.extui %0 : i1 to i32
    %c0_i32_0 = arith.constant 0 : i32
    %2 = arith.cmpi ne, %1, %c0_i32_0 : i32
    scf.if %2 {
      %cst_17 = arith.constant 0.000000e+00 : f32
      %31 = vector.broadcast %cst_17 : f32 to vector<1x1x1xf32>
      %c0_18 = arith.constant 0 : index
      %c0_19 = arith.constant 0 : index
      %c0_20 = arith.constant 0 : index
      %32 = vector.load %arg4[%c0_18, %c0_19, %c0_20] : memref<1x1x1xf32, #tpu.memory_space<vmem>>, vector<1x1x1xf32>
      tpu.vector_store %arg4[%c0_18, %c0_19, %c0_20], %31 {strides = array<i32>} : memref<1x1x1xf32, #tpu.memory_space<vmem>>, vector<1x1x1xf32>,
    } else {
    }
    %c0 = arith.constant 0 : index
    %c0_1 = arith.constant 0 : index
    %3 = vector.load %arg2[%c0, %c0_1] : memref<128x100xf32, #tpu.memory_space<vmem>>, vector<128x100xf32>
    %c0_2 = arith.constant 0 : index
    %c0_3 = arith.constant 0 : index
    %4 = vector.load %arg3[%c0_2, %c0_3] : memref<128x1xi32, #tpu.memory_space<vmem>>, vector<128x1xi32>
    %cst = arith.constant 1.000000e+00 : f32
    %5 = vector.broadcast %cst : f32 to vector<100x1xf32>
    %cst_4 = arith.constant dense<0xFF800000> : vector<128xf32>
    %6 = vector.multi_reduction <maximumf>, %3, %cst_4 [1] : vector<128x100xf32> to vector<128xf32>
    %7 = vector.shape_cast %6 : vector<128xf32> to vector<128x1xf32>
    %8 = vector.broadcast %7 : vector<128x1xf32> to vector<128x100xf32>
    %9 = arith.subf %3, %8 : vector<128x100xf32>
    %cst_5 = arith.constant 0.000000e+00 : f32
    %10 = vector.broadcast %cst_5 : f32 to vector<128x100xf32>
    %11 = arith.minimumf %9, %10 : vector<128x100xf32>
    %12 = math.exp %11 : vector<128x100xf32>
    %cst_6 = arith.constant dense<0.000000e+00> : vector<128x1xf32>
    %13 = tpu.matmul %12, %5, %cst_6 {dimension_numbers = #tpu.dot_dimension_numbers<[1], [0], [0], [1], [0, 0, 1, 1], [], []>, precision = #tpu.contract_precision<fp32>} : vector<128x100xf32>, vector<100x1xf32>, vector<128x1xf32> -> vector<128x1xf32>
    %14 = math.log %13 : vector<128x1xf32>
    %15 = arith.addf %7, %14 : vector<128x1xf32>
    %16 = tpu.iota {dimensions = array<i32: 1>} : vector<128x100xi32>
    %17 = vector.broadcast %4 : vector<128x1xi32> to vector<128x100xi32>
    %18 = arith.cmpi eq, %16, %17 : vector<128x100xi32>
    %cst_7 = arith.constant 9.010000e-01 : f32
    %cst_8 = arith.constant 1.000000e-03 : f32
    %19 = vector.broadcast %cst_7 : f32 to vector<128x100xf32>
    %20 = vector.broadcast %cst_8 : f32 to vector<128x100xf32>
    %21 = arith.select %18, %19, %20 : vector<128x100xi1>, vector<128x100xf32>
    %22 = arith.mulf %3, %21 : vector<128x100xf32>
    %cst_9 = arith.constant dense<0.000000e+00> : vector<128x1xf32>
    %23 = tpu.matmul %22, %5, %cst_9 {dimension_numbers = #tpu.dot_dimension_numbers<[1], [0], [0], [1], [0, 0, 1, 1], [], []>, precision = #tpu.contract_precision<fp32>} : vector<128x100xf32>, vector<100x1xf32>, vector<128x1xf32> -> vector<128x1xf32>
    %24 = arith.subf %15, %23 : vector<128x1xf32>
    %c0_10 = arith.constant 0 : index
    %c0_11 = arith.constant 0 : index
    %c0_12 = arith.constant 0 : index
    %25 = vector.load %arg4[%c0_10, %c0_11, %c0_12] : memref<1x1x1xf32, #tpu.memory_space<vmem>>, vector<1x1x1xf32>
    %cst_13 = arith.constant dense<0.000000e+00> : vector<1xf32>
    %26 = vector.multi_reduction <add>, %24, %cst_13 [0] : vector<128x1xf32> to vector<1xf32>
    %27 = vector.shape_cast %26 : vector<1xf32> to vector<1x1xf32>
    %28 = vector.shape_cast %27 : vector<1x1xf32> to vector<1x1x1xf32>
    %29 = arith.addf %25, %28 : vector<1x1x1xf32>
    %c0_14 = arith.constant 0 : index
    %c0_15 = arith.constant 0 : index
    %c0_16 = arith.constant 0 : index
    %30 = vector.load %arg4[%c0_14, %c0_15, %c0_16] : memref<1x1x1xf32, #tpu.memory_space<vmem>>, vector<1x1x1xf32>
    tpu.vector_store %arg4[%c0_14, %c0_15, %c0_16], %29 {strides = array<i32>} : memref<1x1x1xf32, #tpu.memory_space<vmem>>, vector<1x1x1xf32>,
    return
  }
  func.func @transform_0(%arg0: i32, %arg1: i32) -> (i32, i32) {
    %c1_i32 = arith.constant 1 : i32
    %0 = arith.muli %arg0, %c1_i32 : i32
    %1 = arith.addi %0, %arg1 : i32
    %c0_i32 = arith.constant 0 : i32
    %2 = arith.minsi %1, %c0_i32 : i32
    %c0_i32_0 = arith.constant 0 : i32
    %c0_i32_1 = arith.constant 0 : i32
    return %2, %c0_i32_0 : i32, i32
  }
  func.func @transform_1(%arg0: i32, %arg1: i32) -> (i32, i32) {
    %c1_i32 = arith.constant 1 : i32
    %0 = arith.muli %arg0, %c1_i32 : i32
    %1 = arith.addi %0, %arg1 : i32
    %c0_i32 = arith.constant 0 : i32
    %2 = arith.minsi %1, %c0_i32 : i32
    %c0_i32_0 = arith.constant 0 : i32
    %c0_i32_1 = arith.constant 0 : i32
    return %2, %c0_i32_0 : i32, i32
  }
  func.func @transform_2(%arg0: i32, %arg1: i32) -> (i32, i32, i32) {
    %c0_i32 = arith.constant 0 : i32
    %c0_i32_0 = arith.constant 0 : i32
    %c0_i32_1 = arith.constant 0 : i32
    return %arg0, %c0_i32, %c0_i32_0 : i32, i32, i32
  }
}

</mosaic_0001>

<bundles_post_ra>
// kernel: tpu_custom_call.1
= control target key start
LH: loop header
LB: loop body
LE: loop exit
PB: predicated region body
PF: predicated region fallthrough
CT: control target
= control target key end

     0   :  { %vm114_vm0 = vcmask 818176   ;;  %v4094_v6 = vmov 0   ;;  %s5164_s0 = inlined_call_operand.vmem [shape: f32[128,100], index: 0, kind: input, shape index: {}]   ;;  %s5165_s1 = inlined_call_operand.vmem [shape: s32[128,1], index: 1, kind: input, shape index: {}]   ;;  %s5166_s2 = inlined_call_operand.hbm [shape: f32[1,1,1], index: 2, kind: output, shape index: {}]  }
   0x1   :  { %v4119_v0 = vld [vmem:[%s5164_s0 + $0x10] sm:$0xff]  ;;  %v4124_v1 = vld [vmem:[%s5164_s0] sm:$0xff]  ;;  %v4129_v2 = vld [vmem:[%s5164_s0 + $0x18] sm:$0xff]  ;;  %4005 = vset.pattern.permute.xlu1 %v4094_v6  ;;  %4004 = vset.pattern.permute.xlu0 %v4094_v6 }
   0x2   :  { %v121_v3 = vsel %vm114_vm0, %v4119_v0, -inf  ;;  %v115_v4 = vsel %vm114_vm0, %v4124_v1, -inf  ;;  %v4138_v5 = vld [vmem:[%s5164_s0 + $0x8] sm:$0xff]  ;;  %v124_v7 = vsel %vm114_vm0, %v4129_v2, -inf  ;;  %v4154_v10 = vld [vmem:[%s5164_s0 + $0x20] sm:$0xff]  ;;  %v4163_v13 = vld [vmem:[%s5164_s0 + $0x38] sm:$0xff] }
   0x3   :  { %122 = vmax.xlane.f32.xlu1 %v121_v3  ;;  %116 = vmax.xlane.f32.xlu0 %v115_v4  ;;  %v118_v8 = vsel %vm114_vm0, %v4138_v5, -inf  ;;  %v4149_v9 = vld [vmem:[%s5164_s0 + $0x28] sm:$0xff]  ;;  %v127_v12 = vsel %vm114_vm0, %v4154_v10, -inf  ;;  %v4168_v14 = vld [vmem:[%s5164_s0 + $0x30] sm:$0xff]  ;;  %v136_v15 = vsel %vm114_vm0, %v4163_v13, -inf }
   0x4   :  { %v130_v11 = vsel %vm114_vm0, %v4149_v9, -inf  ;;  %v133_v16 = vsel %vm114_vm0, %v4168_v14, -inf }
   0x7   :  { %125 = vmax.xlane.f32.xlu1 %v124_v7  ;;  %119 = vmax.xlane.f32.xlu0 %v118_v8 }
   0xb   :  { %131 = vmax.xlane.f32.xlu1 %v130_v11  ;;  %128 = vmax.xlane.f32.xlu0 %v127_v12 }
   0xc   :  { %7 = vsyncpa [#allocation3], 0  ;;  %v4177_v17 = vld [vmem:[%s5164_s0 + $0x48] sm:$0xff]  ;;  %v4182_v18 = vld [vmem:[%s5164_s0 + $0x40] sm:$0xff]  ;;  %v5171_v29 = vmov 1.0|1.0  }
   0xd   :  { %v142_v19 = vsel %vm114_vm0, %v4177_v17, -inf  ;;  %v139_v20 = vsel %vm114_vm0, %v4182_v18, -inf  ;;  %v4191_v21 = vld [vmem:[%s5164_s0 + $0x58] sm:$0xff]  ;;  %v4196_v22 = vld [vmem:[%s5164_s0 + $0x50] sm:$0xff]  ;;  %v4205_v25 = vld [vmem:[%s5164_s0 + $0x68] sm:$0xff]  ;;  %3693 = vmatprep.subr.bf16.mxu0 %v5171_v29  ;;  %3765 = vmatprep.subr.bf16.mxu1 %v5171_v29  ;;  %vm275_vm1 = vcmask 1043456  }
   0xe   :  { %v148_v23 = vsel %vm114_vm0, %v4191_v21, -inf  ;;  %v145_v24 = vsel %vm114_vm0, %v4196_v22, -inf  ;;  %v4210_v26 = vld [vmem:[%s5164_s0 + $0x60] sm:$0xff]  ;;  %v154_v27 = vsel %vm114_vm0, %v4205_v25, -inf  ;;  %v4221_v30 = vld [vmem:[%s5164_s0 + $0x78] sm:$0xff]  ;;  %v4226_v31 = vld [vmem:[%s5164_s0 + $0x70] sm:$0xff]  ;;  %3694 = vmatpush3.bf16.msra.mxu0 %v5171_v29  ;;  %3766 = vmatpush3.bf16.msra.mxu1 %v5171_v29 }
   0xf   :  { %137 = vmax.xlane.f32.xlu1 %v136_v15  ;;  %134 = vmax.xlane.f32.xlu0 %v133_v16  ;;  %v151_v28 = vsel %vm114_vm0, %v4210_v26, -inf  ;;  %v160_v32 = vsel %vm114_vm0, %v4221_v30, -inf  ;;  %v157_v33 = vsel %vm114_vm0, %v4226_v31, -inf  ;;  %v99_v34 = vld [vmem:[%s5165_s1 + $0x8] sm:$0xff]  ;;  %v5169_v35 = vmov 1.0   ;;  %v100_v36 = vld [vmem:[%s5165_s1 + $0x10] sm:$0xff] }
  0x10   :  { %3695 = vmatprep.subr.bf16.mxu0 %v5171_v29  ;;  %3767 = vmatprep.subr.bf16.mxu1 %v5171_v29  ;;  %v98_v37 = vld [vmem:[%s5165_s1] sm:$0xff]  ;;  %v101_v38 = vld [vmem:[%s5165_s1 + $0x18] sm:$0xff]  ;;  %v107_v39 = vld [vmem:[%s5165_s1 + $0x48] sm:$0xff]  ;;  %v5173_v42 = vmov 0.0|0.0   ;;  %v277_v7 = vsel %vm275_vm1, 1.0, %v4094_v6 }
  0x11   :  { %v102_v40 = vld [vmem:[%s5165_s1 + $0x20] sm:$0xff]  ;;  %v109_v41 = vld [vmem:[%s5165_s1 + $0x58] sm:$0xff]  ;;  %v103_v43 = vld [vmem:[%s5165_s1 + $0x28] sm:$0xff] }
  0x12   :  { %3696 = vmatpush3.bf16.msra.mxu0 %v5171_v29  ;;  %3768 = vmatpush3.bf16.msra.mxu1 %v5171_v29  ;;  %v111_v44 = vld [vmem:[%s5165_s1 + $0x68] sm:$0xff]  ;;  %v104_v45 = vld [vmem:[%s5165_s1 + $0x30] sm:$0xff]  ;;  %v113_v46 = vld [vmem:[%s5165_s1 + $0x78] sm:$0xff] }
  0x13   :  { %143 = vmax.xlane.f32.xlu1 %v142_v19  ;;  %140 = vmax.xlane.f32.xlu0 %v139_v20  ;;  %v105_v47 = vld [vmem:[%s5165_s1 + $0x38] sm:$0xff]  ;;  %v106_v48 = vld [vmem:[%s5165_s1 + $0x40] sm:$0xff]  ;;  %v108_v49 = vld [vmem:[%s5165_s1 + $0x50] sm:$0xff] }
  0x14   :  { %3697 = vmatprep.subr.bf16.mxu0 %v5171_v29  ;;  %3769 = vmatprep.subr.bf16.mxu1 %v5171_v29  ;;  %v110_v50 = vld [vmem:[%s5165_s1 + $0x60] sm:$0xff]  ;;  %v112_v51 = vld [vmem:[%s5165_s1 + $0x70] sm:$0xff]  ;;  %s4100_s1 = smov [#allocation2]  }
  0x15   :  { %s2719_s15 = sshll.u32 %s4100_s1, 4  ;;  %s2720_s15 = int_to_ptr.vmem [resolvable:$true] %s2719_s15 }
  0x16   :  { %3698 = vmatpush3.bf16.msra.mxu0 %v5171_v29  ;;  %3770 = vmatpush3.bf16.msra.mxu1 %v5171_v29  ;;  %s4070_s16 = scalar_lea.vmem %s2720_s15, 16  ;;  %s4074_s17 = scalar_lea.vmem %s2720_s15, 32 }
  0x17   :  { %149 = vmax.xlane.f32.xlu1 %v148_v23  ;;  %146 = vmax.xlane.f32.xlu0 %v145_v24  ;;  %v4338_v24 = vsub.f32 %v277_v7, %v277_v7  ;;  %p4071_p0 = scmp.ne.s32.totalorder %s2720_s15, %s4070_s16  ;;  %p4075_p1 = scmp.lt.s32.totalorder %s2720_s15, %s2720_s15 }
  0x18   :  { %3699 = vmatprep.subr.bf16.mxu0 %v5171_v29  ;;  %3771 = vmatprep.subr.bf16.mxu1 %v5171_v29  ;;  %p4076_p2 = scmp.lt.s32.totalorder %s4074_s17, %s4070_s16 }
  0x1a   :  { %3700 = vmatpush3.bf16.msra.mxu0 %v5171_v29  ;;  %3772 = vmatpush3.bf16.msra.mxu1 %v5171_v29  ;;  %p4077_p3 = por %p4076_p2, %p4075_p1 }
  0x1b   :  { %155 = vmax.xlane.f32.xlu1 %v154_v27  ;;  %152 = vmax.xlane.f32.xlu0 %v151_v28 }
  0x1c   :  { %3701 = vmatprep.subr.bf16.mxu0 %v5171_v29  ;;  %3773 = vmatprep.subr.bf16.mxu1 %v5171_v29  ;;  %p4078_p4 = pnand %p4077_p3, %p4071_p0 }
  0x1e   :  { %3702 = vmatpush3.bf16.msra.mxu0 %v5171_v29  ;;  %3774 = vmatpush3.bf16.msra.mxu1 %v5171_v29 }
  0x1f   :  { %161 = vmax.xlane.f32.xlu1 %v160_v32  ;;  %158 = vmax.xlane.f32.xlu0 %v157_v33 }
  0x20   :  { %3703 = vmatprep.subr.bf16.mxu0 %v5171_v29  ;;  %3775 = vmatprep.subr.bf16.mxu1 %v5171_v29 }
  0x22   :  { %3704 = vmatpush3.bf16.msra.mxu0 %v5171_v29  ;;  %3776 = vmatpush3.bf16.msra.mxu1 %v5171_v29 }
  0x23   :  { %3117 = vmatprep.subr.msk.mxu0 %vm275_vm1, %v5169_v35  ;;  %3417 = vmatprep.subr.msk.mxu1 %vm275_vm1, %v5169_v35 }
  0x26   :  { %3118 = vmatpush3.msk.msra.mxu0 %vm275_vm1, %v5169_v35  ;;  %3418 = vmatpush3.msk.msra.mxu1 %vm275_vm1, %v5169_v35 }
  0x27   :  { %3705 = vmatprep.subr.bf16.mxu0 %v5173_v42  ;;  %3777 = vmatprep.subr.bf16.mxu1 %v5173_v42 }
  0x30   :  { %1424 = vperm.xlu1 %4005, %v99_v34  }
  0x34   :  { %1427 = vperm.xlu1 %4005, %v100_v36  }
  0x35   :  { %1421 = vperm.xlu0 %4004, %v98_v37  }
  0x38   :  { %1430 = vperm.xlu1 %4005, %v101_v38   ;;  %v1418_v38 = vlaneseq }
  0x39   :  { %1448 = vperm.xlu0 %4004, %v107_v39  }
  0x3c   :  { %1433 = vperm.xlu1 %4005, %v102_v40  }
  0x3d   :  { %1454 = vperm.xlu0 %4004, %v109_v41   ;;  %v4353_v41 = vand.u32 4294901760, %v4338_v24 }
  0x3f   :  { %5273 = vst [vmem:[#allocation15_spill] sm:$0xff] %v4353_v41 }
  0x40   :  { %1436 = vperm.xlu1 %4005, %v103_v43  }
  0x41   :  { %1460 = vperm.xlu0 %4004, %v111_v44  }
  0x44   :  { %1439 = vperm.xlu1 %4005, %v104_v45  }
  0x45   :  { %1466 = vperm.xlu0 %4004, %v113_v46  }
  0x48   :  { %1442 = vperm.xlu1 %4005, %v105_v47  }
  0x4c   :  { %1445 = vperm.xlu1 %4005, %v106_v48  }
  0x50   :  { %1451 = vperm.xlu1 %4005, %v108_v49  }
  0x54   :  { %1457 = vperm.xlu1 %4005, %v110_v50  }
  0x58   :  { %1463 = vperm.xlu1 %4005, %v112_v51  }
  0x90   :  { %v4312_v52 = vpop.xlane.xlu1 %122  ;;  %v4314_v53 = vpop.xlane.xlu0 %116 }
  0x91   :  { %5263 = vst [vmem:[#allocation5_spill] sm:$0xff] %v4312_v52  ;;  %5264 = vst [vmem:[#allocation6_spill] sm:$0xff] %v4314_v53  ;;  %v165_v54 = vsub.f32 %v4119_v0, %v4312_v52  ;;  %v163_v55 = vsub.f32 %v4124_v1, %v4314_v53 }
  0x93   :  { %v181_v56 = vmin.f32 %v165_v54, 0.0  ;;  %v179_v57 = vmin.f32 %v163_v55, 0.0  ;;  %v4360_v54 = vand.u32 127, %v1418_v38 }
  0x94   :  { %v4320_v58 = vpop.xlane.xlu1 %125  ;;  %v4322_v59 = vpop.xlane.xlu0 %119 }
  0x95   :  { %5265 = vst [vmem:[#allocation7_spill] sm:$0xff] %v4320_v58  ;;  %5266 = vst [vmem:[#allocation8_spill] sm:$0xff] %v4322_v59  ;;  %v199_v60 = vmul.f32 1.442695, %v181_v56  ;;  %v195_v61 = vmul.f32 1.442695, %v179_v57  ;;  %v166_v62 = vsub.f32 %v4129_v2, %v4320_v58  ;;  %v164_v63 = vsub.f32 %v4138_v5, %v4322_v59 }
  0x97   :  { %4006 = vpow2.f32 %v199_v60  ;;  %v182_v3 = vmin.f32 %v166_v62, 0.0  ;;  %v180_v4 = vmin.f32 %v164_v63, 0.0  ;;  %v533_v62 = vsub.f32 %v4338_v24, %v4353_v41 }
  0x98   :  { %4008 = vpow2.f32 %v195_v61  ;;  %v4330_v8 = vpop.xlane.xlu1 %131  ;;  %v4332_v11 = vpop.xlane.xlu0 %128 }
  0x99   :  { %5267 = vst [vmem:[#allocation9_spill] sm:$0xff] %v4330_v8  ;;  %5268 = vst [vmem:[#allocation10_spill] sm:$0xff] %v4332_v11  ;;  %v201_v12 = vmul.f32 1.442695, %v182_v3  ;;  %v197_v15 = vmul.f32 1.442695, %v180_v4  ;;  %v168_v16 = vsub.f32 %v4149_v9, %v4330_v8  ;;  %v167_v19 = vsub.f32 %v4154_v10, %v4332_v11 }
  0x9b   :  { %4010 = vpow2.f32 %v201_v12  ;;  %v184_v20 = vmin.f32 %v168_v16, 0.0  ;;  %v183_v23 = vmin.f32 %v167_v19, 0.0 }
  0x9c   :  { %4012 = vpow2.f32 %v197_v15  ;;  %v4340_v6 = vpop.xlane.xlu1 %137  ;;  %v4342_v27 = vpop.xlane.xlu0 %134 }
  0x9d   :  { %5269 = vst [vmem:[#allocation11_spill] sm:$0xff] %v4340_v6  ;;  %5270 = vst [vmem:[#allocation12_spill] sm:$0xff] %v4342_v27  ;;  %v205_v28 = vmul.f32 1.442695, %v184_v20  ;;  %v203_v32 = vmul.f32 1.442695, %v183_v23  ;;  %v170_v33 = vsub.f32 %v4163_v13, %v4340_v6  ;;  %v169_v34 = vsub.f32 %v4168_v14, %v4342_v27 }
  0x9f   :  { %4014 = vpow2.f32 %v205_v28  ;;  %v186_v36 = vmin.f32 %v170_v33, 0.0  ;;  %v185_v37 = vmin.f32 %v169_v34, 0.0 }
  0xa0   :  { %4016 = vpow2.f32 %v203_v32  ;;  %v4348_v39 = vpop.xlane.xlu1 %143  ;;  %v4350_v40 = vpop.xlane.xlu0 %140 }
  0xa1   :  { %5271 = vst [vmem:[#allocation13_spill] sm:$0xff] %v4348_v39  ;;  %5272 = vst [vmem:[#allocation14_spill] sm:$0xff] %v4350_v40  ;;  %v4007_v43 = vpop.eup %4006  ;;  %v209_v44 = vmul.f32 1.442695, %v186_v36  ;;  %v207_v45 = vmul.f32 1.442695, %v185_v37  ;;  %v172_v46 = vsub.f32 %v4177_v17, %v4348_v39  ;;  %v171_v47 = vsub.f32 %v4182_v18, %v4350_v40 }
  0xa2   :  { %v4009_v48 = vpop.eup %4008  ;;  %v234_v49 = vsel %vm114_vm0, %v4007_v43, 0  ;;  %v4393_v43 = vand.u32 4294901760, %v533_v62 }
  0xa3   :  { %v188_v50 = vmin.f32 %v172_v46, 0.0  ;;  %v187_v51 = vmin.f32 %v171_v47, 0.0  ;;  %v228_v55 = vsel %vm114_vm0, %v4009_v48, 0  ;;  %4018 = vpow2.f32 %v209_v44 }
  0xa4   :  { %v4363_v56 = vpop.xlane.xlu1 %149  ;;  %v4365_v57 = vpop.xlane.xlu0 %146  ;;  %v4367_v60 = vand.u32 4294901760, %v228_v55  ;;  %v4369_v61 = vand.u32 4294901760, %v234_v49  ;;  %4020 = vpow2.f32 %v207_v45 }
  0xa5   :  { %5274 = vst [vmem:[#allocation16_spill] sm:$0xff] %v4363_v56  ;;  %5275 = vst [vmem:[#allocation17_spill] sm:$0xff] %v4365_v57  ;;  %v4011_v63 = vpop.eup %4010  ;;  %v174_v3 = vsub.f32 %v4191_v21, %v4363_v56  ;;  %v173_v4 = vsub.f32 %v4196_v22, %v4365_v57  ;;  %v213_v12 = vmul.f32 1.442695, %v188_v50  ;;  %v211_v15 = vmul.f32 1.442695, %v187_v51 }
  0xa6   :  { %v4013_v7 = vpop.eup %4012  ;;  %v4378_v16 = vsub.f32 %v228_v55, %v4367_v60  ;;  %v4381_v19 = vsub.f32 %v234_v49, %v4369_v61  ;;  %v237_v32 = vsel %vm114_vm0, %v4011_v63, 0 }
  0xa7   :  { %v190_v20 = vmin.f32 %v174_v3, 0.0  ;;  %v189_v23 = vmin.f32 %v173_v4, 0.0  ;;  %v231_v28 = vsel %vm114_vm0, %v4013_v7, 0  ;;  %4022 = vpow2.f32 %v213_v12 }
  0xa8   :  { %v4385_v33 = vpop.xlane.xlu1 %155  ;;  %v4387_v34 = vpop.xlane.xlu0 %152  ;;  %v5168_v36 = vand.u32 4294901760, %v4378_v16  ;;  %v4390_v37 = vand.u32 4294901760, %v231_v28  ;;  %v5167_v38 = vand.u32 4294901760, %v4381_v19  ;;  %v4405_v55 = vand.u32 4294901760, %v237_v32 }
  0xa9   :  { %5276 = vst [vmem:[#allocation18_spill] sm:$0xff] %v4385_v33  ;;  %5277 = vst [vmem:[#allocation19_spill] sm:$0xff] %v4387_v34  ;;  %v4015_v44 = vpop.eup %4014  ;;  %v217_v45 = vmul.f32 1.442695, %v190_v20  ;;  %v215_v46 = vmul.f32 1.442695, %v189_v23  ;;  %v176_v47 = vsub.f32 %v4205_v25, %v4385_v33  ;;  %v175_v48 = vsub.f32 %v4210_v26, %v4387_v34 }
  0xaa   :  { %v4017_v49 = vpop.eup %4016  ;;  %v348_v50 = vsub.f32 %v4378_v16, %v5168_v36  ;;  %v4403_v51 = vsub.f32 %v231_v28, %v4390_v37  ;;  %4024 = vpow2.f32 %v211_v15  ;;  %v368_v63 = vsub.f32 %v4381_v19, %v5167_v38 }
  0xab   :  { %v192_v62 = vmin.f32 %v176_v47, 0.0  ;;  %v240_v3 = vsel %vm114_vm0, %v4017_v49, 0  ;;  %4026 = vpow2.f32 %v217_v45  ;;  %v191_v4 = vmin.f32 %v175_v48, 0.0 }
  0xac   :  { %v4411_v7 = vpop.xlane.xlu1 %161  ;;  %v4413_v12 = vpop.xlane.xlu0 %158  ;;  %v349_v20 = vand.u32 4294901760, %v348_v50  ;;  %v5177_v23 = vand.u32 4294901760, %v4403_v51  ;;  %4028 = vpow2.f32 %v215_v46  ;;  %v4424_v48 = vsub.f32 %v237_v32, %v4405_v55 }
  0xad   :  { %5278 = vst [vmem:[#allocation20_spill] sm:$0xff] %v4411_v7  ;;  %5279 = vst [vmem:[#allocation21_spill] sm:$0xff] %v4413_v12  ;;  %v221_v28 = vmul.f32 1.442695, %v192_v62  ;;  %v178_v15 = vsub.f32 %v4221_v30, %v4411_v7  ;;  %v177_v47 = vsub.f32 %v4226_v31, %v4413_v12  ;;  %v4019_v38 = vpop.eup %4018  ;;  %v4426_v49 = vand.u32 4294901760, %v240_v3 }
  0xae   :  { %3119 = vmatprep.mubr.f32.mxu0 %v349_v20  ;;  %v358_v45 = vsub.f32 %v4403_v51, %v5177_v23  ;;  %v243_v46 = vsel %vm114_vm0, %v4015_v44, 0  ;;  %v4021_v50 = vpop.eup %4020  ;;  %v369_v35 = vand.u32 4294901760, %v368_v63  ;;  %v219_v42 = vmul.f32 1.442695, %v191_v4 }
  0xaf   :  { %v194_v62 = vmin.f32 %v178_v15, 0.0  ;;  %v193_v36 = vmin.f32 %v177_v47, 0.0  ;;  %v4429_v29 = vand.u32 4294901760, %v243_v46  ;;  %v5182_v7 = vand.u32 4294901760, %v4424_v48 }
  0xb0   :  { %v1425_v12 = vpop.permute.xlu1 %1424  ;;  %v359_v20 = vand.u32 4294901760, %v358_v45  ;;  %v4433_v23 = vsub.f32 %v240_v3, %v4426_v49  ;;  %4030 = vpow2.f32 %v221_v28  ;;  %v5178_v15 = vmov 0.001  }
  0xb1   :  { %v225_v32 = vmul.f32 1.442695, %v194_v62  ;;  %vm1469_vm2 = vcmp.eq.s32.totalorder %v4360_v54, %v1425_v12  ;;  %v4437_v44 = vsub.f32 %v243_v46, %v4429_v29  ;;  %v378_v4 = vsub.f32 %v4424_v48, %v5182_v7 }
  0xb2   :  { %v1485_v63 = vsel %vm1469_vm2, 0.901, %v5178_v15  ;;  %3120 = vmatmul.mubr.f32.vlgmr.msra.gmra.mrb[0].mxu0 %v359_v20  ;;  %v5183_v47 = vand.u32 4294901760, %v4433_v23  ;;  %v246_v3 = vsel %vm114_vm0, %v4021_v50, 0  ;;  %v223_v45 = vmul.f32 1.442695, %v193_v36  ;;  %v4023_v15 = vpop.eup %4022 }
  0xb3   :  { %5280 = vst [vmem:[#allocation22_spill] sm:$0xff] %v4437_v44  ;;  %v1501_v28 = vmul.f32 %v1485_v63, %v4138_v5  ;;  %3122 = vmatprep.mubr.f32.mxu0 %v369_v35  ;;  %v5281_v12 = vmov 0.0|0.0   ;;  %v5185_v46 = vand.u32 4294901760, %v4437_v44  ;;  %v4448_v62 = vand.u32 4294901760, %v246_v3 }
  0xb4   :  { %3706 = vmatpush3.bf16.msra.mxu0 %v5281_v12  ;;  %4032 = vpow2.f32 %v219_v42  ;;  %v1428_v20 = vpop.permute.xlu1 %1427  ;;  %v1422_v34 = vpop.permute.xlu0 %1421  ;;  %v379_v33 = vand.u32 4294901760, %v378_v4  ;;  %v388_v7 = vsub.f32 %v4433_v23, %v5183_v47  ;;  %v249_v5 = vsel %vm114_vm0, %v4019_v38, 0 }
  0xb5   :  { %3707 = vmatprep.subr.bf16.mxu0 %v5281_v12  ;;  %v4025_v35 = vpop.eup %4024  ;;  %v1520_v36 = vsel %vm114_vm0, %v1501_v28, 0  ;;  %vm1470_vm3 = vcmp.eq.s32.totalorder %v4360_v54, %v1428_v20  ;;  %vm1468_vm4 = vcmp.eq.s32.totalorder %v4360_v54, %v1422_v34  ;;  %v398_v42 = vsub.f32 %v4437_v44, %v5185_v46 }
  0xb6   :  { %v4461_v50 = vpop.eup %4026  ;;  %4034 = vpow2.f32 %v225_v32  ;;  %v5282_v63 = vmov 0.001   ;;  %3123 = vmatmul.mubr.f32.gmra.mrb[2].mxu0 %v379_v33  ;;  %v389_v38 = vand.u32 4294901760, %v388_v7  ;;  %v4468_v34 = vsub.f32 %v246_v3, %v4448_v62 }
  0xb7   :  { %v1486_v4 = vsel %vm1470_vm3, 0.901, %v5282_v63  ;;  %v1484_v47 = vsel %vm1468_vm4, 0.901, %v5282_v63  ;;  %v4029_v57 = vpop.eup %4028  ;;  %4036 = vpow2.f32 %v223_v45  ;;  %v4471_v46 = vand.u32 4294901760, %v1520_v36 }
  0xb8   :  { %v1502_v28 = vmul.f32 %v1486_v4, %v4119_v0  ;;  %v1500_v20 = vmul.f32 %v1484_v47, %v4124_v1  ;;  %5283 = vst [vmem:[#allocation23_spill] sm:$0xff] %v4468_v34  ;;  %3708 = vmatpush3.bf16.msra.mxu0 %v5281_v12  ;;  %v1431_v32 = vpop.permute.xlu1 %1430  ;;  %3125 = vmatprep.mubr.f32.mxu0 %v389_v38  ;;  %v1449_v56 = vpop.permute.xlu0 %1448  ;;  %v399_v40 = vand.u32 4294901760, %v398_v42  ;;  %v4473_v39 = vand.u32 4294901760, %v249_v5 }
  0xb9   :  { %3709 = vmatprep.subr.bf16.mxu0 %v5281_v12  ;;  %v252_v33 = vsel %vm114_vm0, %v4025_v35, 0  ;;  %vm1471_vm5 = vcmp.eq.s32.totalorder %v4360_v54, %v1431_v32  ;;  %vm1477_vm6 = vcmp.eq.s32.totalorder %v4360_v54, %v1449_v56  ;;  %v255_v45 = vsel %vm114_vm0, %v4023_v15, 0 }
  0xba   :  { %v1523_v0 = vsel %vm114_vm0, %v1502_v28, 0  ;;  %v4479_v1 = vsel %vm114_vm0, %v1500_v20, 0  ;;  %v1487_v47 = vsel %vm1471_vm5, 0.901, %v5282_v63  ;;  %v1493_v3 = vsel %vm1477_vm6, 0.901, %v5282_v63  ;;  %3126 = vmatmul.mubr.f32.gmra.mrb[4].mxu0 %v399_v40  ;;  %v4488_v42 = vpop.eup %4030 }
  0xbb   :  { %v4483_v7 = vand.u32 4294901760, %v1523_v0  ;;  %v1503_v35 = vmul.f32 %v1487_v47, %v4129_v2  ;;  %v1509_v4 = vmul.f32 %v1493_v3, %v4177_v17  ;;  %v5191_v38 = vand.u32 4294901760, %v4468_v34 }
  0xbc   :  { %v4494_v28 = vsub.f32 %v249_v5, %v4473_v39  ;;  %3710 = vmatpush3.bf16.msra.mxu0 %v5281_v12  ;;  %v4498_v56 = vsub.f32 %v1520_v36, %v4471_v46  ;;  %v4504_v15 = vand.u32 4294901760, %v4479_v1  ;;  %v1434_v20 = vpop.permute.xlu1 %1433  ;;  %v1455_v2 = vpop.permute.xlu0 %1454  ;;  %v4506_v32 = vand.u32 4294901760, %v252_v33 }
  0xbd   :  { %v4501_v40 = vsub.f32 %v1523_v0, %v4483_v7  ;;  %3711 = vmatprep.subr.bf16.mxu0 %v5281_v12  ;;  %v1526_v17 = vsel %vm114_vm0, %v1503_v35, 0  ;;  %v1544_v5 = vsel %vm114_vm0, %v1509_v4, 0  ;;  %vm1472_vm7 = vcmp.eq.s32.totalorder %v4360_v54, %v1434_v20 }
  0xbe   :  { %5284 = vst [vmem:[#allocation24_spill] sm:$0xff] %v4494_v28  ;;  %5285 = vst [vmem:[#allocation25_spill] sm:$0xff] %v4498_v56  ;;  %v408_v36 = vsub.f32 %v4468_v34, %v5191_v38  ;;  %v4515_v0 = vpop.eup %4032  ;;  %v1488_v47 = vsel %vm1472_vm7, 0.901, %v5282_v63  ;;  %vm1479_vm8 = vcmp.eq.s32.totalorder %v4360_v54, %v1455_v2  ;;  %v4519_v3 = vand.u32 4294901760, %v255_v45 }
  0xbf   :  { %5286 = vst [vmem:[#allocation26_spill] sm:$0xff] %v4501_v40  ;;  %v258_v27 = vsel %vm114_vm0, %v4029_v57, 0  ;;  %v1504_v35 = vmul.f32 %v1488_v47, %v4154_v10  ;;  %v1495_v4 = vsel %vm1479_vm8, 0.901, %v5282_v63  ;;  %v5200_v20 = vand.u32 4294901760, %v4494_v28 }
  0xc0   :  { %v409_v6 = vand.u32 4294901760, %v408_v36  ;;  %3712 = vmatpush3.bf16.msra.mxu0 %v5281_v12  ;;  %v4526_v38 = vpop.eup %4034  ;;  %v4528_v11 = vand.u32 4294901760, %v1526_v17  ;;  %v4530_v8 = vand.u32 4294901760, %v1544_v5  ;;  %v1511_v2 = vmul.f32 %v1495_v4, %v4191_v21  ;;  %v1437_v52 = vpop.permute.xlu1 %1436 }
  0xc1   :  { %v4534_v57 = vsub.f32 %v252_v33, %v4506_v32  ;;  %v1461_v10 = vpop.permute.xlu0 %1460  ;;  %3713 = vmatprep.subr.bf16.mxu0 %v5281_v12  ;;  %v4537_v36 = vpop.eup %4036  ;;  %v1529_v47 = vsel %vm114_vm0, %v1504_v35, 0  ;;  %v418_v58 = vsub.f32 %v4494_v28, %v5200_v20  ;;  %vm1473_vm9 = vcmp.eq.s32.totalorder %v4360_v54, %v1437_v52 }
  0xc2   :  { %3128 = vmatprep.mubr.f32.mxu0 %v409_v6  ;;  %vm1481_vm10 = vcmp.eq.s32.totalorder %v4360_v54, %v1461_v10  ;;  %v4545_v21 = vand.u32 4294901760, %v1529_v47  ;;  %v1550_v33 = vsel %vm114_vm0, %v1511_v2, 0  ;;  %v1489_v4 = vsel %vm1473_vm9, 0.901, %v5282_v63 }
  0xc3   :  { %5287 = vst [vmem:[#allocation27_spill] sm:$0xff] %v4534_v57  ;;  %v5203_v53 = vand.u32 4294901760, %v4534_v57  ;;  %v4550_v59 = vand.u32 4294901760, %v1550_v33  ;;  %v419_v35 = vand.u32 4294901760, %v418_v58  ;;  %v1505_v6 = vmul.f32 %v1489_v4, %v4149_v9 }
  0xc4   :  { %v1497_v41 = vsel %vm1481_vm10, 0.901, %v5282_v63  ;;  %3714 = vmatpush3.bf16.msra.mxu0 %v5281_v12  ;;  %v4556_v52 = vsub.f32 %v1526_v17, %v4528_v11  ;;  %v4563_v20 = vsub.f32 %v255_v45, %v4519_v3  ;;  %v1440_v28 = vpop.permute.xlu1 %1439  ;;  %v4567_v9 = vsub.f32 %v1544_v5, %v4530_v8 }
  0xc5   :  { %5288 = vst [vmem:[#allocation28_spill] sm:$0xff] %v4550_v59  ;;  %v428_v2 = vsub.f32 %v4534_v57, %v5203_v53  ;;  %v1513_v10 = vmul.f32 %v1497_v41, %v4205_v25  ;;  %3715 = vmatprep.subr.bf16.mxu0 %v5281_v12  ;;  %3129 = vmatmul.mubr.f32.gmra.mrb[6].mxu0 %v419_v35  ;;  %v1532_v58 = vsel %vm114_vm0, %v1505_v6, 0  ;;  %v4571_v17 = vand.u32 4294901760, %v258_v27  ;;  %v1467_v4 = vpop.permute.xlu0 %1466 }
  0xc6   :  { %5289 = vst [vmem:[#allocation29_spill] sm:$0xff] %v4556_v52  ;;  %5290 = vst [vmem:[#allocation30_spill] sm:$0xff] %v4563_v20  ;;  %vm1474_vm11 = vcmp.eq.s32.totalorder %v4360_v54, %v1440_v28  ;;  %v4574_v53 = vsub.f32 %v1529_v47, %v4545_v21  ;;  %v5210_v45 = vand.u32 4294901760, %v4563_v20  ;;  %v4579_v57 = vsub.f32 %v1550_v33, %v4550_v59 }
  0xc7   :  { %v429_v25 = vand.u32 4294901760, %v428_v2  ;;  %v1556_v41 = vsel %vm114_vm0, %v1513_v10, 0  ;;  %v1490_v5 = vsel %vm1474_vm11, 0.901, %v5282_v63  ;;  %v4583_v35 = vsub.f32 %v258_v27, %v4571_v17 }
  0xc8   :  { %v4587_v28 = vsub.f32 %v4479_v1, %v4504_v15  ;;  %3716 = vmatpush3.bf16.msra.mxu0 %v5281_v12  ;;  %v4590_v47 = vand.u32 4294901760, %v1532_v58  ;;  %v438_v6 = vsub.f32 %v4563_v20, %v5210_v45  ;;  %v1506_v33 = vmul.f32 %v1490_v5, %v4168_v14  ;;  %v1443_v2 = vpop.permute.xlu1 %1442 }
  0xc9   :  { %5291 = vst [vmem:[#allocation31_spill] sm:$0xff] %v4583_v35  ;;  %3131 = vmatprep.mubr.f32.mxu0 %v429_v25  ;;  %vm1483_vm12 = vcmp.eq.s32.totalorder %v4360_v54, %v1467_v4  ;;  %v4597_v27 = vand.u32 4294901760, %v1556_v41  ;;  %v5215_v10 = vand.u32 4294901760, %v4583_v35  ;;  %3167 = vmatprep.subr.mxu0 %v4393_v43  ;;  %v261_v14 = vsel %vm114_vm0, %v4461_v50, 0 }
  0xca   :  { %5292 = vst [vmem:[#allocation32_spill] sm:$0xff] %v4587_v28  ;;  %v5216_v1 = vand.u32 4294901760, %v4587_v28  ;;  %v1499_v34 = vsel %vm1483_vm12, 0.901, %v5282_v63  ;;  %v439_v25 = vand.u32 4294901760, %v438_v6  ;;  %v1535_v44 = vsel %vm114_vm0, %v1506_v33, 0 }
  0xcb   :  { %5293 = vst [vmem:[#allocation33_spill] sm:$0xff] %v4597_v27  ;;  %v1515_v45 = vmul.f32 %v1499_v34, %v4221_v30  ;;  %v4607_v4 = vand.u32 4294901760, %v1535_v44  ;;  %v448_v5 = vsub.f32 %v4583_v35, %v5215_v10  ;;  %v4615_v59 = vand.u32 4294901760, %v261_v14 }
  0xcc   :  { %v1633_v20 = vsub.f32 %v4587_v28, %v5216_v1  ;;  %3168 = vmatpush3.msra.mxu0 %v4393_v43  ;;  %v4619_v6 = vsub.f32 %v1532_v58, %v4590_v47  ;;  %v5221_v30 = vand.u32 4294901760, %v4498_v56  ;;  %v5224_v50 = vand.u32 4294901760, %v4501_v40  ;;  %v1446_v34 = vpop.permute.xlu1 %1445 }
  0xcd   :  { %3132 = vmatmul.mubr.f32.gmra.mrb[8].mxu0 %v439_v25  ;;  %vm1475_vm13 = vcmp.eq.s32.totalorder %v4360_v54, %v1443_v2  ;;  %3717 = vmatprep.subr.bf16.mxu0 %v5281_v12  ;;  %v4626_v33 = vsub.f32 %v1556_v41, %v4597_v27  ;;  %v449_v10 = vand.u32 4294901760, %v448_v5  ;;  %v4629_v35 = vsel %vm114_vm0, %v1515_v45, 0 }
  0xce   :  { %v1634_v1 = vand.u32 4294901760, %v1633_v20  ;;  %v4632_v58 = vsub.f32 %v261_v14, %v4615_v59  ;;  %v1643_v25 = vsub.f32 %v4498_v56, %v5221_v30  ;;  %v1653_v2 = vsub.f32 %v4501_v40, %v5224_v50 }
  0xcf   :  { %v1491_v28 = vsel %vm1475_vm13, 0.901, %v5282_v63  ;;  %v4642_v41 = vsub.f32 %v1535_v44, %v4607_v4  ;;  %3134 = vmatprep.mubr.f32.mxu0 %v449_v10  ;;  %v264_v45 = vsel %vm114_vm0, %v4515_v0, 0  ;;  %v267_v14 = vsel %vm114_vm0, %v4488_v42, 0 }
  0xd0   :  { %5294 = vst [vmem:[#allocation34_spill] sm:$0xff] %v4632_v58  ;;  %3419 = vmatprep.mubr.f32.mxu1 %v1634_v1  ;;  %v1507_v20 = vmul.f32 %v1491_v28, %v4163_v13  ;;  %v5230_v5 = vand.u32 4294901760, %v4632_v58  ;;  %v1644_v30 = vand.u32 4294901760, %v1643_v25  ;;  %v1654_v56 = vand.u32 4294901760, %v1653_v2  ;;  %v1452_v40 = vpop.permute.xlu1 %1451 }
  0xd1   :  { %v4650_v50 = vand.u32 4294901760, %v264_v45  ;;  %v4653_v27 = vand.u32 4294901760, %v267_v14  ;;  %v5229_v10 = vand.u32 4294901760, %v4556_v52  ;;  %vm1476_vm14 = vcmp.eq.s32.totalorder %v4360_v54, %v1446_v34 }
  0xd2   :  { %v1538_v44 = vsel %vm114_vm0, %v1507_v20, 0  ;;  %v458_v13 = vsub.f32 %v4632_v58, %v5230_v5  ;;  %3420 = vmatmul.mubr.f32.vlgmr.msra.gmra.mrb[0].mxu1 %v1644_v30  ;;  %v1492_v28 = vsel %vm1476_vm14, 0.901, %v5282_v63  ;;  %v270_v30 = vsel %vm114_vm0, %v4537_v36, 0 }
  0xd3   :  { %v4660_v42 = vand.u32 4294901760, %v1538_v44  ;;  %v4663_v0 = vsub.f32 %v264_v45, %v4650_v50  ;;  %3422 = vmatprep.mubr.f32.mxu1 %v1654_v56  ;;  %v4667_v1 = vsub.f32 %v267_v14, %v4653_v27  ;;  %v1663_v34 = vsub.f32 %v4556_v52, %v5229_v10  ;;  %3778 = vmatpush3.bf16.msra.mxu1 %v5281_v12 }
  0xd4   :  { %v1508_v25 = vmul.f32 %v1492_v28, %v4182_v18  ;;  %v459_v2 = vand.u32 4294901760, %v458_v13  ;;  %v4680_v45 = vand.u32 4294901760, %v270_v30  ;;  %3779 = vmatprep.subr.bf16.mxu1 %v5281_v12  ;;  %v1458_v14 = vpop.permute.xlu1 %1457  ;;  %v5241_v36 = vand.u32 4294901760, %v4574_v53 }
  0xd5   :  { %5295 = vst [vmem:[#allocation35_spill] sm:$0xff] %v4663_v0  ;;  %5296 = vst [vmem:[#allocation36_spill] sm:$0xff] %v4667_v1  ;;  %v4677_v20 = vsub.f32 %v1538_v44, %v4660_v42  ;;  %v5233_v56 = vand.u32 4294901760, %v4663_v0  ;;  %v5236_v10 = vand.u32 4294901760, %v4667_v1  ;;  %v1664_v5 = vand.u32 4294901760, %v1663_v34 }
  0xd6   :  { %v1541_v18 = vsel %vm114_vm0, %v1508_v25, 0  ;;  %3135 = vmatmul.mubr.f32.gmra.mrb[10].mxu0 %v459_v2  ;;  %v4692_v28 = vsub.f32 %v270_v30, %v4680_v45  ;;  %v273_v52 = vsel %vm114_vm0, %v4526_v38, 0  ;;  %v1673_v25 = vsub.f32 %v4574_v53, %v5241_v36 }
  0xd7   :  { %v468_v44 = vsub.f32 %v4663_v0, %v5233_v56  ;;  %v4689_v13 = vand.u32 4294901760, %v1541_v18  ;;  %v478_v34 = vsub.f32 %v4667_v1, %v5236_v10  ;;  %3423 = vmatmul.mubr.f32.gmra.mrb[2].mxu1 %v1664_v5  ;;  %v4702_v2 = vand.u32 4294901760, %v273_v52 }
  0xd8   :  { %vm1478_vm15 = vcmp.eq.s32.totalorder %v4360_v54, %v1452_v40  ;;  %v5244_v0 = vand.u32 4294901760, %v4692_v28  ;;  %3780 = vmatpush3.bf16.msra.mxu1 %v5281_v12  ;;  %v1464_v10 = vpop.permute.xlu1 %1463  ;;  %v1674_v1 = vand.u32 4294901760, %v1673_v25  ;;  %vm1480_vm2 = vcmp.eq.s32.totalorder %v4360_v54, %v1458_v14 }
  0xd9   :  { %v469_v56 = vand.u32 4294901760, %v468_v44  ;;  %v4706_v30 = vsub.f32 %v1541_v18, %v4689_v13  ;;  %v1494_v38 = vsel %vm1478_vm15, 0.901, %v5282_v63  ;;  %v479_v5 = vand.u32 4294901760, %v478_v34  ;;  %3781 = vmatprep.subr.bf16.mxu1 %v5281_v12 }
  0xda   :  { %v4712_v58 = vsub.f32 %v273_v52, %v4702_v2  ;;  %v1510_v36 = vmul.f32 %v1494_v38, %v4196_v22  ;;  %v488_v40 = vsub.f32 %v4692_v28, %v5244_v0  ;;  %v5243_v18 = vand.u32 4294901760, %v4619_v6  ;;  %3425 = vmatprep.mubr.f32.mxu1 %v1674_v1 }
  0xdb   :  { %3137 = vmatprep.mubr.f32.mxu0 %v469_v56  ;;  %v5245_v44 = vand.u32 4294901760, %v4642_v41  ;;  %v1496_v22 = vsel %vm1480_vm2, 0.901, %v5282_v63  ;;  %vm1482_vm3 = vcmp.eq.s32.totalorder %v4360_v54, %v1464_v10  ;;  %v5249_v10 = vand.u32 4294901760, %v4677_v20 }
  0xdc   :  { %3138 = vmatmul.mubr.f32.gmra.mrb[12].mxu0 %v479_v5  ;;  %v5242_v52 = vand.u32 4294901760, %v4712_v58  ;;  %v1547_v34 = vsel %vm114_vm0, %v1510_v36, 0  ;;  %v489_v56 = vand.u32 4294901760, %v488_v40  ;;  %v1683_v38 = vsub.f32 %v4619_v6, %v5243_v18  ;;  %3782 = vmatpush3.bf16.msra.mxu1 %v5281_v12 }
  0xdd   :  { %v4726_v25 = vand.u32 4294901760, %v1547_v34  ;;  %v1512_v14 = vmul.f32 %v1496_v22, %v4210_v26  ;;  %v1693_v36 = vsub.f32 %v4642_v41, %v5245_v44  ;;  %v1498_v54 = vsel %vm1482_vm3, 0.901, %v5282_v63  ;;  %3783 = vmatprep.subr.bf16.mxu1 %v5281_v12 }
  0xde   :  { %v498_v1 = vsub.f32 %v4712_v58, %v5242_v52  ;;  %3140 = vmatprep.mubr.f32.mxu0 %v489_v56  ;;  %v1684_v26 = vand.u32 4294901760, %v1683_v38  ;;  %v1514_v22 = vmul.f32 %v1498_v54, %v4226_v31  ;;  %v1703_v63 = vsub.f32 %v4677_v20, %v5249_v10 }
  0xdf   :  { %5297 = vst [vmem:[#allocation37_spill] sm:$0xff] %v4726_v25  ;;  %v4743_v5 = vsub.f32 %v1547_v34, %v4726_v25  ;;  %v1553_v40 = vsel %vm114_vm0, %v1512_v14, 0  ;;  %v1694_v0 = vand.u32 4294901760, %v1693_v36  ;;  %v5246_v56 = vand.u32 4294901760, %v4706_v30 }
  0xe0   :  { %v499_v52 = vand.u32 4294901760, %v498_v1  ;;  %v4747_v18 = vand.u32 4294901760, %v1553_v40  ;;  %3426 = vmatmul.mubr.f32.gmra.mrb[4].mxu1 %v1684_v26  ;;  %v1559_v44 = vsel %vm114_vm0, %v1514_v22, 0  ;;  %v5247_v34 = vand.u32 4294901760, %v4567_v9 }
  0xe1   :  { %v5248_v38 = vand.u32 4294901760, %v4743_v5  ;;  %v4757_v14 = vand.u32 4294901760, %v4629_v35  ;;  %3428 = vmatprep.mubr.f32.mxu1 %v1694_v0  ;;  %v4762_v1 = vand.u32 4294901760, %v1559_v44  ;;  %v1704_v36 = vand.u32 4294901760, %v1703_v63  ;;  %3784 = vmatpush3.bf16.msra.mxu1 %v5281_v12 }
  0xe2   :  { %5298 = vst [vmem:[#allocation38_spill] sm:$0xff] %v4747_v18  ;;  %3141 = vmatmul.mubr.f32.gmra.mrb[14].mxu0 %v499_v52  ;;  %v4760_v31 = vsub.f32 %v1553_v40, %v4747_v18  ;;  %v1713_v54 = vsub.f32 %v4706_v30, %v5246_v56  ;;  %v1723_v26 = vsub.f32 %v4567_v9, %v5247_v34  ;;  %v5254_v0 = vand.u32 4294901760, %v4579_v57 }
  0xe3   :  { %5299 = vst [vmem:[#allocation39_spill] sm:$0xff] %v4757_v14  ;;  %5300 = vst [vmem:[#allocation40_spill] sm:$0xff] %v4762_v1  ;;  %3169 = vmatprep.mubr.f32.mxu0 %v4367_v60  ;;  %v1733_v52 = vsub.f32 %v4743_v5, %v5248_v38  ;;  %v4777_v40 = vsub.f32 %v1559_v44, %v4762_v1  ;;  %3785 = vmatprep.subr.bf16.mxu1 %v5281_v12  ;;  %vm80_vm0 = vcmask 0  }
  0xe4   :  { %v5250_v22 = vand.u32 4294901760, %v4760_v31  ;;  %3429 = vmatmul.mubr.f32.gmra.mrb[6].mxu1 %v1704_v36  ;;  %v1714_v63 = vand.u32 4294901760, %v1713_v54  ;;  %v4788_v10 = vsub.f32 %v4629_v35, %v4757_v14  ;;  %v1724_v44 = vand.u32 4294901760, %v1723_v26 }
  0xe5   :  { %v1734_v56 = vand.u32 4294901760, %v1733_v52  ;;  %v5252_v38 = vand.u32 4294901760, %v4777_v40  ;;  %v1743_v36 = vsub.f32 %v4579_v57, %v5254_v0  ;;  %v5253_v54 = vand.u32 4294901760, %v4626_v33  ;;  %3786 = vmatpush3.bf16.msra.mxu1 %v5281_v12  ;;  %v5314_v0 = vld [vmem:[#allocation26_spill] sm:$0xff] }
  0xe6   :  { %3170 = vmatmul.mubr.f32.vlgmr.msra.gmra.mrb[0].mxu0 %v4390_v37  ;;  %v1753_v34 = vsub.f32 %v4760_v31, %v5250_v22  ;;  %3431 = vmatprep.mubr.f32.mxu1 %v1714_v63  ;;  %v5251_v63 = vand.u32 4294901760, %v4788_v10 }
  0xe7   :  { %3172 = vmatprep.mubr.f32.mxu0 %v4369_v61  ;;  %3718 = vmatpush3.bf16.msra.mxu0 %v5281_v12  ;;  %v1773_v52 = vsub.f32 %v4777_v40, %v5252_v38  ;;  %v1744_v26 = vand.u32 4294901760, %v1743_v36  ;;  %v1763_v22 = vsub.f32 %v4626_v33, %v5253_v54  ;;  %v5311_v38 = vld [vmem:[#allocation25_spill] sm:$0xff]  ;;  %v5312_v54 = vld [vmem:[#allocation34_spill] sm:$0xff] }
  0xe8   :  { %3719 = vmatprep.subr.bf16.mxu0 %v5281_v12  ;;  %3432 = vmatmul.mubr.f32.gmra.mrb[8].mxu1 %v1724_v44  ;;  %v1754_v35 = vand.u32 4294901760, %v1753_v34  ;;  %v1783_v44 = vsub.f32 %v4788_v10, %v5251_v63  ;;  %v5310_v63 = vld [vmem:[#allocation31_spill] sm:$0xff] }
  0xe9   :  { %3434 = vmatprep.mubr.f32.mxu1 %v1734_v56  ;;  %3787 = vmatprep.subr.bf16.mxu1 %v5281_v12  ;;  %v1774_v56 = vand.u32 4294901760, %v1773_v52  ;;  %v1764_v34 = vand.u32 4294901760, %v1763_v22  ;;  %v5302_v22 = vld [vmem:[#allocation28_spill] sm:$0xff]  ;;  %v5304_v52 = vld [vmem:[#allocation23_spill] sm:$0xff] }
  0xea   :  { %3173 = vmatmul.mubr.f32.gmra.mrb[2].mxu0 %v4405_v55  ;;  %3788 = vmatpush3.bf16.msra.mxu1 %v5281_v12  ;;  %v1784_v36 = vand.u32 4294901760, %v1783_v44  ;;  %v5308_v44 = vld [vmem:[#allocation30_spill] sm:$0xff] }
  0xeb   :  { %3175 = vmatprep.mubr.f32.mxu0 %v4426_v49  ;;  %3720 = vmatpush3.bf16.msra.mxu0 %v5281_v12 }
  0xec   :  { %3721 = vmatprep.subr.bf16.mxu0 %v5281_v12  ;;  %3435 = vmatmul.mubr.f32.gmra.mrb[10].mxu1 %v1744_v26  ;;  %v5305_v26 = vld [vmem:[#allocation33_spill] sm:$0xff] }
  0xed   :  { %3437 = vmatprep.mubr.f32.mxu1 %v1754_v35  ;;  %3467 = vmatprep.subr.mxu1 %v4393_v43  ;;  %v5303_v35 = vld [vmem:[#allocation22_spill] sm:$0xff] }
  0xee   :  { %3176 = vmatmul.mubr.f32.gmra.mrb[4].mxu0 %v4429_v29  ;;  %3468 = vmatpush3.msra.mxu1 %v4393_v43  ;;  %v5301_v43 = vmov 1.0|1.0  }
  0xef   :  { %3178 = vmatprep.mubr.f32.mxu0 %v4448_v62  ;;  %3722 = vmatpush3.bf16.msra.mxu0 %v5281_v12 }
  0xf0   :  { %3723 = vmatprep.subr.bf16.mxu0 %v5281_v12  ;;  %3438 = vmatmul.mubr.f32.gmra.mrb[12].mxu1 %v1764_v34  ;;  %v5307_v34 = vld [vmem:[#allocation27_spill] sm:$0xff] }
  0xf1   :  { %3440 = vmatprep.mubr.f32.mxu1 %v1774_v56  ;;  %3789 = vmatprep.subr.bf16.mxu1 %v5281_v12  ;;  %v5306_v56 = vld [vmem:[#allocation24_spill] sm:$0xff] }
  0xf2   :  { %3179 = vmatmul.mubr.f32.gmra.mrb[6].mxu0 %v4473_v39 }
  0xf3   :  { %3181 = vmatprep.mubr.f32.mxu0 %v4506_v32  ;;  %3724 = vmatpush3.bf16.msra.mxu0 %v5281_v12 }
  0xf4   :  { %3725 = vmatprep.subr.bf16.mxu0 %v5281_v12  ;;  %3441 = vmatmul.mubr.f32.gmra.mrb[14].mxu1 %v1784_v36  ;;  %v5309_v36 = vld [vmem:[#allocation32_spill] sm:$0xff] }
  0xf5   :  { %3469 = vmatprep.mubr.f32.mxu1 %v4504_v15 }
  0xf6   :  { %3182 = vmatmul.mubr.f32.gmra.mrb[8].mxu0 %v4519_v3 }
  0xf7   :  { %3184 = vmatprep.mubr.f32.mxu0 %v4571_v17  ;;  %3726 = vmatpush3.bf16.msra.mxu0 %v5281_v12 }
  0xf8   :  { %3727 = vmatprep.subr.bf16.mxu0 %v5281_v12  ;;  %3470 = vmatmul.mubr.f32.vlgmr.msra.gmra.mrb[0].mxu1 %v4471_v46 }
  0xf9   :  { %3790 = vmatpush3.bf16.msra.mxu1 %v5281_v12  ;;  %3472 = vmatprep.mubr.f32.mxu1 %v4483_v7 }
  0xfa   :  { %3185 = vmatmul.mubr.f32.gmra.mrb[10].mxu0 %v4615_v59  ;;  %3791 = vmatprep.subr.bf16.mxu1 %v5281_v12 }
  0xfb   :  { %3187 = vmatprep.mubr.f32.mxu0 %v4650_v50  ;;  %3728 = vmatpush3.bf16.msra.mxu0 %v5281_v12 }
  0xfc   :  { %3217 = vmatprep.subr.mxu0 %v4338_v24  ;;  %3473 = vmatmul.mubr.f32.gmra.mrb[2].mxu1 %v4528_v11 }
  0xfd   :  { %3475 = vmatprep.mubr.f32.mxu1 %v4545_v21  ;;  %3792 = vmatpush3.bf16.msra.mxu1 %v5281_v12 }
  0xfe   :  { %3188 = vmatmul.mubr.f32.gmra.mrb[12].mxu0 %v4653_v27  ;;  %3793 = vmatprep.subr.bf16.mxu1 %v5281_v12 }
  0xff   :  { %3190 = vmatprep.mubr.f32.mxu0 %v4680_v45  ;;  %3218 = vmatpush3.msra.mxu0 %v4338_v24 }
 0x100   :  { %3729 = vmatprep.subr.bf16.mxu0 %v5301_v43  ;;  %3476 = vmatmul.mubr.f32.gmra.mrb[4].mxu1 %v4590_v47 }
 0x101   :  { %3478 = vmatprep.mubr.f32.mxu1 %v4607_v4  ;;  %3794 = vmatpush3.bf16.msra.mxu1 %v5281_v12 }
 0x102   :  { %3191 = vmatmul.mubr.f32.gmra.mrb[14].mxu0 %v4702_v2  ;;  %3795 = vmatprep.subr.bf16.mxu1 %v5281_v12 }
 0x103   :  { %3219 = vmatprep.mubr.f32.mxu0 %v4378_v16 }
 0x104   :  { %3479 = vmatmul.mubr.f32.gmra.mrb[6].mxu1 %v4660_v42 }
 0x105   :  { %3481 = vmatprep.mubr.f32.mxu1 %v4689_v13  ;;  %3796 = vmatpush3.bf16.msra.mxu1 %v5281_v12 }
 0x106   :  { %3220 = vmatmul.mubr.f32.vlgmr.msra.gmra.mrb[0].mxu0 %v4403_v51  ;;  %3797 = vmatprep.subr.bf16.mxu1 %v5281_v12 }
 0x107   :  { %3222 = vmatprep.mubr.f32.mxu0 %v4381_v19  ;;  %3730 = vmatpush3.bf16.msra.mxu0 %v5301_v43 }
 0x108   :  { %3731 = vmatprep.subr.bf16.mxu0 %v5301_v43  ;;  %3482 = vmatmul.mubr.f32.gmra.mrb[8].mxu1 %v4530_v8 }
 0x109   :  { %3484 = vmatprep.mubr.f32.mxu1 %v4726_v25  ;;  %3798 = vmatpush3.bf16.msra.mxu1 %v5281_v12  ;;  %v5320_v25 = vand.u32 4294901760, %v4381_v19  ;;  %v5323_v19 = vand.u32 4294901760, %v5303_v35 }
 0x10a   :  { %3223 = vmatmul.mubr.f32.gmra.mrb[2].mxu0 %v4424_v48  ;;  %3799 = vmatprep.subr.bf16.mxu1 %v5281_v12 }
 0x10b   :  { %3225 = vmatprep.mubr.f32.mxu0 %v4433_v23  ;;  %3732 = vmatpush3.bf16.msra.mxu0 %v5301_v43 }
 0x10c   :  { %3733 = vmatprep.subr.bf16.mxu0 %v5301_v43  ;;  %3485 = vmatmul.mubr.f32.gmra.mrb[10].mxu1 %v5302_v22  ;;  %v5319_v22 = vand.u32 4294901760, %v4403_v51  ;;  %v5322_v51 = vand.u32 4294901760, %v4433_v23  ;;  %v5325_v23 = vand.u32 4294901760, %v5306_v56 }
 0x10d   :  { %3487 = vmatprep.mubr.f32.mxu1 %v4747_v18  ;;  %3800 = vmatpush3.bf16.msra.mxu1 %v5281_v12  ;;  %v5318_v18 = vand.u32 4294901760, %v4378_v16  ;;  %v5321_v16 = vand.u32 4294901760, %v4424_v48  ;;  %v5324_v48 = vand.u32 4294901760, %v5304_v52 }
 0x10e   :  { %3226 = vmatmul.mubr.f32.gmra.mrb[4].mxu0 %v5303_v35  ;;  %3517 = vmatprep.subr.mxu1 %v4338_v24  ;;  %v5329_v35 = vand.u32 4294901760, %v5310_v63 }
 0x10f   :  { %3228 = vmatprep.mubr.f32.mxu0 %v5304_v52  ;;  %3734 = vmatpush3.bf16.msra.mxu0 %v5301_v43  ;;  %v5330_v52 = vand.u32 4294901760, %v5311_v38 }
 0x110   :  { %3735 = vmatprep.subr.bf16.mxu0 %v5301_v43  ;;  %3488 = vmatmul.mubr.f32.gmra.mrb[12].mxu1 %v5305_v26  ;;  %v5317_v26 = vld [vmem:[#allocation36_spill] sm:$0xff] }
 0x111   :  { %3490 = vmatprep.mubr.f32.mxu1 %v4762_v1  ;;  %3518 = vmatpush3.msra.mxu1 %v4338_v24  ;;  %v5313_v24 = vld [vmem:[#allocation35_spill] sm:$0xff]  ;;  %v5316_v1 = vld [vmem:[#allocation29_spill] sm:$0xff] }
 0x112   :  { %3229 = vmatmul.mubr.f32.gmra.mrb[6].mxu0 %v5306_v56  ;;  %3801 = vmatprep.subr.bf16.mxu1 %v5301_v43  ;;  %v5331_v56 = vand.u32 4294901760, %v5312_v54 }
 0x113   :  { %3231 = vmatprep.mubr.f32.mxu0 %v5307_v34  ;;  %3736 = vmatpush3.bf16.msra.mxu0 %v5301_v43 }
 0x114   :  { %3737 = vmatprep.subr.bf16.mxu0 %v5301_v43  ;;  %3491 = vmatmul.mubr.f32.gmra.mrb[14].mxu1 %v4757_v14  ;;  %v5315_v14 = vmov 1.0  }
 0x115   :  { %3519 = vmatprep.mubr.f32.mxu1 %v5309_v36 }
 0x116   :  { %3232 = vmatmul.mubr.f32.gmra.mrb[8].mxu0 %v5308_v44 }
 0x117   :  { %3234 = vmatprep.mubr.f32.mxu0 %v5310_v63  ;;  %3738 = vmatpush3.bf16.msra.mxu0 %v5301_v43  ;;  %v5333_v63 = vand.u32 4294901760, %v5314_v0 }
 0x118   :  { %3739 = vmatprep.subr.bf16.mxu0 %v5301_v43  ;;  %3520 = vmatmul.mubr.f32.vlgmr.msra.gmra.mrb[0].mxu1 %v5311_v38  ;;  %v5336_v38 = vand.u32 4294901760, %v5317_v26 }
 0x119   :  { %3802 = vmatpush3.bf16.msra.mxu1 %v5301_v43  ;;  %3522 = vmatprep.mubr.f32.mxu1 %v5314_v0  ;;  %v5340_v0 = vand.u32 4294901760, %v4712_v58 }
 0x11a   :  { %3235 = vmatmul.mubr.f32.gmra.mrb[10].mxu0 %v5312_v54  ;;  %3803 = vmatprep.subr.bf16.mxu1 %v5301_v43  ;;  %v5337_v54 = vand.u32 4294901760, %v4574_v53 }
 0x11b   :  { %3237 = vmatprep.mubr.f32.mxu0 %v5313_v24  ;;  %3740 = vmatpush3.bf16.msra.mxu0 %v5301_v43 }
 0x11c   :  { %3267 = vmatprep.subr.msk.mxu0 %vm275_vm1, %v5315_v14  ;;  %3523 = vmatmul.mubr.f32.gmra.mrb[2].mxu1 %v5316_v1 }
 0x11d   :  { %3525 = vmatprep.mubr.f32.mxu1 %v4574_v53  ;;  %3804 = vmatpush3.bf16.msra.mxu1 %v5301_v43  ;;  %v5341_v53 = vand.u32 4294901760, %v4642_v41 }
 0x11e   :  { %3238 = vmatmul.mubr.f32.gmra.mrb[12].mxu0 %v5317_v26  ;;  %3805 = vmatprep.subr.bf16.mxu1 %v5301_v43 }
 0x11f   :  { %3240 = vmatprep.mubr.f32.mxu0 %v4692_v28  ;;  %3268 = vmatpush3.msk.msra.mxu0 %vm275_vm1, %v5315_v14 }
 0x120   :  { %3741 = vmatprep.subr.bf16.mxu0 %v5281_v12  ;;  %3526 = vmatmul.mubr.f32.gmra.mrb[4].mxu1 %v4619_v6 }
 0x121   :  { %3528 = vmatprep.mubr.f32.mxu1 %v4642_v41  ;;  %3806 = vmatpush3.bf16.msra.mxu1 %v5301_v43  ;;  %v5345_v41 = vand.u32 4294901760, %v4743_v5 }
 0x122   :  { %3241 = vmatmul.mubr.f32.gmra.mrb[14].mxu0 %v4712_v58  ;;  %3807 = vmatprep.subr.bf16.mxu1 %v5301_v43  ;;  %v5344_v58 = vand.u32 4294901760, %v4567_v9 }
 0x123   :  { %3269 = vmatprep.mubr.f32.mxu0 %v5318_v18  ;;  %v5326_v18 = vand.u32 4294901760, %v5307_v34  ;;  %v5332_v34 = vand.u32 4294901760, %v5313_v24  ;;  %v5338_v24 = vand.u32 4294901760, %v4692_v28  ;;  %v5342_v28 = vand.u32 4294901760, %v4677_v20 }
 0x124   :  { %3529 = vmatmul.mubr.f32.gmra.mrb[6].mxu1 %v4677_v20  ;;  %v5346_v20 = vand.u32 4294901760, %v4579_v57 }
 0x125   :  { %3531 = vmatprep.mubr.f32.mxu1 %v4706_v30  ;;  %3808 = vmatpush3.bf16.msra.mxu1 %v5301_v43 }
 0x126   :  { %3270 = vmatmul.mubr.f32.vlgmr.msra.gmra.mrb[0].mxu0 %v5319_v22  ;;  %3809 = vmatprep.subr.bf16.mxu1 %v5301_v43  ;;  %v5328_v22 = vand.u32 4294901760, %v5309_v36  ;;  %v5335_v36 = vand.u32 4294901760, %v5316_v1  ;;  %v5339_v1 = vand.u32 4294901760, %v4619_v6  ;;  %v5343_v6 = vand.u32 4294901760, %v4706_v30 }
 0x127   :  { %3272 = vmatprep.mubr.f32.mxu0 %v5320_v25  ;;  %3742 = vmatpush3.bf16.msra.mxu0 %v5281_v12  ;;  %v5327_v25 = vand.u32 4294901760, %v5308_v44  ;;  %v5334_v44 = vld [vmem:[#allocation15_spill] sm:$0xff]  ;;  %v5348_v30 = vand.u32 4294901760, %v4626_v33 }
 0x128   :  { %3743 = vmatprep.subr.bf16.mxu0 %v5281_v12  ;;  %3532 = vmatmul.mubr.f32.gmra.mrb[8].mxu1 %v4567_v9  ;;  %v5347_v9 = vand.u32 4294901760, %v4760_v31 }
 0x129   :  { %3534 = vmatprep.mubr.f32.mxu1 %v4743_v5  ;;  %3810 = vmatpush3.bf16.msra.mxu1 %v5301_v43 }
 0x12a   :  { %3273 = vmatmul.mubr.f32.gmra.mrb[2].mxu0 %v5321_v16  ;;  %3811 = vmatprep.subr.bf16.mxu1 %v5301_v43 }
 0x12b   :  { %3275 = vmatprep.mubr.f32.mxu0 %v5322_v51  ;;  %3744 = vmatpush3.bf16.msra.mxu0 %v5281_v12 }
 0x12c   :  { %3745 = vmatprep.subr.bf16.mxu0 %v5281_v12  ;;  %3535 = vmatmul.mubr.f32.gmra.mrb[10].mxu1 %v4579_v57  ;;  %v5349_v57 = vand.u32 4294901760, %v4777_v40 }
 0x12d   :  { %3537 = vmatprep.mubr.f32.mxu1 %v4760_v31  ;;  %3812 = vmatpush3.bf16.msra.mxu1 %v5301_v43 }
 0x12e   :  { %3276 = vmatmul.mubr.f32.gmra.mrb[4].mxu0 %v5323_v19  ;;  %3567 = vmatprep.subr.msk.mxu1 %vm275_vm1, %v5315_v14 }
 0x12f   :  { %3278 = vmatprep.mubr.f32.mxu0 %v5324_v48  ;;  %3746 = vmatpush3.bf16.msra.mxu0 %v5281_v12 }
 0x130   :  { %3747 = vmatprep.subr.bf16.mxu0 %v5281_v12  ;;  %3538 = vmatmul.mubr.f32.gmra.mrb[12].mxu1 %v4626_v33  ;;  %v5352_v33 = vld [vmem:[#allocation28_spill] sm:$0xff] }
 0x131   :  { %3540 = vmatprep.mubr.f32.mxu1 %v4777_v40  ;;  %3568 = vmatpush3.msk.msra.mxu1 %vm275_vm1, %v5315_v14 }
 0x132   :  { %3279 = vmatmul.mubr.f32.gmra.mrb[6].mxu0 %v5325_v23  ;;  %3813 = vmatprep.subr.bf16.mxu1 %v5281_v12 }
 0x133   :  { %3281 = vmatprep.mubr.f32.mxu0 %v5326_v18  ;;  %3748 = vmatpush3.bf16.msra.mxu0 %v5281_v12  ;;  %v5359_v18 = vld [vmem:[#allocation7_spill] sm:$0xff] }
 0x134   :  { %3749 = vmatprep.subr.bf16.mxu0 %v5281_v12  ;;  %3541 = vmatmul.mubr.f32.gmra.mrb[14].mxu1 %v4788_v10 }
 0x135   :  { %3569 = vmatprep.mubr.f32.mxu1 %v5328_v22 }
 0x136   :  { %3282 = vmatmul.mubr.f32.gmra.mrb[8].mxu0 %v5327_v25 }
 0x137   :  { %3284 = vmatprep.mubr.f32.mxu0 %v5329_v35  ;;  %3750 = vmatpush3.bf16.msra.mxu0 %v5281_v12 }
 0x138   :  { %3751 = vmatprep.subr.bf16.mxu0 %v5281_v12  ;;  %3570 = vmatmul.mubr.f32.vlgmr.msra.gmra.mrb[0].mxu1 %v5330_v52 }
 0x139   :  { %3814 = vmatpush3.bf16.msra.mxu1 %v5281_v12  ;;  %3572 = vmatprep.mubr.f32.mxu1 %v5333_v63 }
 0x13a   :  { %3285 = vmatmul.mubr.f32.gmra.mrb[10].mxu0 %v5331_v56  ;;  %3815 = vmatprep.subr.bf16.mxu1 %v5281_v12 }
 0x13b   :  { %3287 = vmatprep.mubr.f32.mxu0 %v5332_v34  ;;  %3752 = vmatpush3.bf16.msra.mxu0 %v5281_v12  ;;  %v5360_v34 = vld [vmem:[#allocation5_spill] sm:$0xff] }
 0x13c   :  { %3317 = vmatprep.subr.mxu0 %v5334_v44  ;;  %3573 = vmatmul.mubr.f32.gmra.mrb[2].mxu1 %v5335_v36 }
 0x13d   :  { %3575 = vmatprep.mubr.f32.mxu1 %v5337_v54  ;;  %3816 = vmatpush3.bf16.msra.mxu1 %v5281_v12 }
 0x13e   :  { %3288 = vmatmul.mubr.f32.gmra.mrb[12].mxu0 %v5336_v38  ;;  %3817 = vmatprep.subr.bf16.mxu1 %v5281_v12 }
 0x13f   :  { %3290 = vmatprep.mubr.f32.mxu0 %v5338_v24  ;;  %3318 = vmatpush3.msra.mxu0 %v5334_v44 }
 0x140   :  { %3753 = vmatprep.subr.bf16.mxu0 %v5301_v43  ;;  %3576 = vmatmul.mubr.f32.gmra.mrb[4].mxu1 %v5339_v1 }
 0x141   :  { %3578 = vmatprep.mubr.f32.mxu1 %v5341_v53  ;;  %3818 = vmatpush3.bf16.msra.mxu1 %v5281_v12 }
 0x142   :  { %3291 = vmatmul.mubr.f32.gmra.mrb[14].mxu0 %v5340_v0  ;;  %3819 = vmatprep.subr.bf16.mxu1 %v5281_v12 }
 0x143   :  { %3319 = vmatprep.mubr.f32.mxu0 %v4367_v60 }
 0x144   :  { %3579 = vmatmul.mubr.f32.gmra.mrb[6].mxu1 %v5342_v28  ;;  %v5361_v28 = vld [vmem:[#allocation9_spill] sm:$0xff] }
 0x145   :  { %3581 = vmatprep.mubr.f32.mxu1 %v5343_v6  ;;  %3820 = vmatpush3.bf16.msra.mxu1 %v5281_v12 }
 0x146   :  { %3320 = vmatmul.mubr.f32.vlgmr.msra.gmra.mrb[0].mxu0 %v4390_v37  ;;  %3821 = vmatprep.subr.bf16.mxu1 %v5281_v12 }
 0x147   :  { %3322 = vmatprep.mubr.f32.mxu0 %v4369_v61  ;;  %3754 = vmatpush3.bf16.msra.mxu0 %v5301_v43 }
 0x148   :  { %3755 = vmatprep.subr.bf16.mxu0 %v5301_v43  ;;  %3582 = vmatmul.mubr.f32.gmra.mrb[8].mxu1 %v5344_v58 }
 0x149   :  { %3584 = vmatprep.mubr.f32.mxu1 %v5345_v41  ;;  %3822 = vmatpush3.bf16.msra.mxu1 %v5281_v12 }
 0x14a   :  { %3323 = vmatmul.mubr.f32.gmra.mrb[2].mxu0 %v4405_v55  ;;  %3823 = vmatprep.subr.bf16.mxu1 %v5281_v12 }
 0x14b   :  { %3325 = vmatprep.mubr.f32.mxu0 %v4426_v49  ;;  %3756 = vmatpush3.bf16.msra.mxu0 %v5301_v43 }
 0x14c   :  { %3757 = vmatprep.subr.bf16.mxu0 %v5301_v43  ;;  %3585 = vmatmul.mubr.f32.gmra.mrb[10].mxu1 %v5346_v20 }
 0x14d   :  { %3587 = vmatprep.mubr.f32.mxu1 %v5347_v9  ;;  %3824 = vmatpush3.bf16.msra.mxu1 %v5281_v12  ;;  %v5350_v12 = vand.u32 4294901760, %v4788_v10 }
 0x14e   :  { %3326 = vmatmul.mubr.f32.gmra.mrb[4].mxu0 %v4429_v29  ;;  %3617 = vmatprep.subr.mxu1 %v5334_v44 }
 0x14f   :  { %3328 = vmatprep.mubr.f32.mxu0 %v4448_v62  ;;  %3758 = vmatpush3.bf16.msra.mxu0 %v5301_v43 }
 0x150   :  { %3759 = vmatprep.subr.bf16.mxu0 %v5301_v43  ;;  %3588 = vmatmul.mubr.f32.gmra.mrb[12].mxu1 %v5348_v30  ;;  %v5362_v30 = vld [vmem:[#allocation10_spill] sm:$0xff] }
 0x151   :  { %3590 = vmatprep.mubr.f32.mxu1 %v5349_v57  ;;  %3618 = vmatpush3.msra.mxu1 %v5334_v44 }
 0x152   :  { %3329 = vmatmul.mubr.f32.gmra.mrb[6].mxu0 %v4473_v39  ;;  %3825 = vmatprep.subr.bf16.mxu1 %v5301_v43 }
 0x153   :  { %3331 = vmatprep.mubr.f32.mxu0 %v4506_v32  ;;  %3760 = vmatpush3.bf16.msra.mxu0 %v5301_v43 }
 0x154   :  { %3761 = vmatprep.subr.bf16.mxu0 %v5301_v43  ;;  %3591 = vmatmul.mubr.f32.gmra.mrb[14].mxu1 %v5350_v12 }
 0x155   :  { %3619 = vmatprep.mubr.f32.mxu1 %v4504_v15 }
 0x156   :  { %3332 = vmatmul.mubr.f32.gmra.mrb[8].mxu0 %v4519_v3 }
 0x157   :  { %3334 = vmatprep.mubr.f32.mxu0 %v4571_v17  ;;  %3762 = vmatpush3.bf16.msra.mxu0 %v5301_v43 }
 0x158   :  { %3763 = vmatprep.subr.bf16.mxu0 %v5301_v43  ;;  %3620 = vmatmul.mubr.f32.vlgmr.msra.gmra.mrb[0].mxu1 %v4471_v46 }
 0x159   :  { %3826 = vmatpush3.bf16.msra.mxu1 %v5301_v43  ;;  %3622 = vmatprep.mubr.f32.mxu1 %v4483_v7 }
 0x15a   :  { %3335 = vmatmul.mubr.f32.gmra.mrb[10].mxu0 %v4615_v59  ;;  %3827 = vmatprep.subr.bf16.mxu1 %v5301_v43 }
 0x15b   :  { %3337 = vmatprep.mubr.f32.mxu0 %v4650_v50  ;;  %3764 = vmatpush3.bf16.msra.mxu0 %v5301_v43 }
 0x15c   :  { %3367 = vmatprep.subr.msk.mxu0 %vm275_vm1, %v5315_v14  ;;  %3623 = vmatmul.mubr.f32.gmra.mrb[2].mxu1 %v4528_v11 }
 0x15d   :  { %3625 = vmatprep.mubr.f32.mxu1 %v4545_v21  ;;  %3828 = vmatpush3.bf16.msra.mxu1 %v5301_v43 }
 0x15e   :  { %3338 = vmatmul.mubr.f32.gmra.mrb[12].mxu0 %v4653_v27  ;;  %3829 = vmatprep.subr.bf16.mxu1 %v5301_v43 }
 0x15f   :  { %3340 = vmatprep.mubr.f32.mxu0 %v4680_v45  ;;  %3368 = vmatpush3.msk.msra.mxu0 %vm275_vm1, %v5315_v14 }
 0x160   :  { %3626 = vmatmul.mubr.f32.gmra.mrb[4].mxu1 %v4590_v47 }
 0x161   :  { %3628 = vmatprep.mubr.f32.mxu1 %v4607_v4  ;;  %3830 = vmatpush3.bf16.msra.mxu1 %v5301_v43 }
 0x162   :  { %3341 = vmatmul.mubr.f32.gmra.mrb[14].mxu0 %v4702_v2  ;;  %3831 = vmatprep.subr.bf16.mxu1 %v5301_v43 }
 0x163   :  { %3369 = vmatprep.mubr.f32.mxu0 %v4367_v60  ;;  %v5351_v60 = vld [vmem:[#allocation37_spill] sm:$0xff] }
 0x164   :  { %3629 = vmatmul.mubr.f32.gmra.mrb[6].mxu1 %v4660_v42 }
 0x165   :  { %3631 = vmatprep.mubr.f32.mxu1 %v4689_v13  ;;  %3832 = vmatpush3.bf16.msra.mxu1 %v5301_v43 }
 0x166   :  { %3370 = vmatmul.mubr.f32.vlgmr.msra.gmra.mrb[0].mxu0 %v4390_v37  ;;  %3833 = vmatprep.subr.bf16.mxu1 %v5301_v43  ;;  %v5354_v37 = vld [vmem:[#allocation33_spill] sm:$0xff] }
 0x167   :  { %3372 = vmatprep.mubr.f32.mxu0 %v4369_v61  ;;  %v5353_v61 = vld [vmem:[#allocation38_spill] sm:$0xff] }
 0x168   :  { %3632 = vmatmul.mubr.f32.gmra.mrb[8].mxu1 %v4530_v8 }
 0x169   :  { %3634 = vmatprep.mubr.f32.mxu1 %v5351_v60  ;;  %3834 = vmatpush3.bf16.msra.mxu1 %v5301_v43 }
 0x16a   :  { %3373 = vmatmul.mubr.f32.gmra.mrb[2].mxu0 %v4405_v55  ;;  %3835 = vmatprep.subr.bf16.mxu1 %v5301_v43  ;;  %v5355_v55 = vld [vmem:[#allocation40_spill] sm:$0xff] }
 0x16b   :  { %3375 = vmatprep.mubr.f32.mxu0 %v4426_v49 }
 0x16c   :  { %3635 = vmatmul.mubr.f32.gmra.mrb[10].mxu1 %v5352_v33 }
 0x16d   :  { %3637 = vmatprep.mubr.f32.mxu1 %v5353_v61  ;;  %3836 = vmatpush3.bf16.msra.mxu1 %v5301_v43 }
 0x16e   :  { %3376 = vmatmul.mubr.f32.gmra.mrb[4].mxu0 %v4429_v29  ;;  %3667 = vmatprep.subr.msk.mxu1 %vm275_vm1, %v5315_v14  ;;  %v5356_v29 = vld [vmem:[#allocation39_spill] sm:$0xff] }
 0x16f   :  { %3378 = vmatprep.mubr.f32.mxu0 %v4448_v62 }
 0x170   :  { %3638 = vmatmul.mubr.f32.gmra.mrb[12].mxu1 %v5354_v37 }
 0x171   :  { %3640 = vmatprep.mubr.f32.mxu1 %v5355_v55  ;;  %3668 = vmatpush3.msk.msra.mxu1 %vm275_vm1, %v5315_v14  ;;  %vm2672_vm1 = vcmask 7168   ;;  %v5358_v14 = vld [vmem:[#allocation6_spill] sm:$0xff] }
 0x172   :  { %3379 = vmatmul.mubr.f32.gmra.mrb[6].mxu0 %v4473_v39 }
 0x173   :  { %3381 = vmatprep.mubr.f32.mxu0 %v4506_v32 }
 0x174   :  { %3641 = vmatmul.mubr.f32.gmra.mrb[14].mxu1 %v5356_v29 }
 0x175   :  { %3669 = vmatprep.mubr.f32.mxu1 %v4504_v15 }
 0x176   :  { %3382 = vmatmul.mubr.f32.gmra.mrb[8].mxu0 %v4519_v3 }
 0x177   :  { %3384 = vmatprep.mubr.f32.mxu0 %v4571_v17 }
 0x178   :  { %3670 = vmatmul.mubr.f32.vlgmr.msra.gmra.mrb[0].mxu1 %v4471_v46 }
 0x179   :  { %3672 = vmatprep.mubr.f32.mxu1 %v4483_v7 }
 0x17a   :  { %3385 = vmatmul.mubr.f32.gmra.mrb[10].mxu0 %v4615_v59  ;;  %v4099_v59 = vmov 0.0  }
 0x17b   :  { %3387 = vmatprep.mubr.f32.mxu0 %v4650_v50  ;;  %81 = vst.msk [vmem:[#allocation2] sm:$0x1] %vm80_vm0, %v4099_v59 }
 0x17c   :  { %3673 = vmatmul.mubr.f32.gmra.mrb[2].mxu1 %v4528_v11 }
 0x17d   :  { %3675 = vmatprep.mubr.f32.mxu1 %v4545_v21 }
 0x17e   :  { %3388 = vmatmul.mubr.f32.gmra.mrb[12].mxu0 %v4653_v27 }
 0x17f   :  { %3390 = vmatprep.mubr.f32.mxu0 %v4680_v45  ;;  %v5357_v45 = vld [vmem:[#allocation8_spill] sm:$0xff] }
 0x180   :  { %3676 = vmatmul.mubr.f32.gmra.mrb[4].mxu1 %v4590_v47 }
 0x181   :  { %3678 = vmatprep.mubr.f32.mxu1 %v4607_v4 }
 0x182   :  { %3391 = vmatmul.mubr.f32.gmra.mrb[14].mxu0 %v4702_v2 }
 0x184   :  { %3679 = vmatmul.mubr.f32.gmra.mrb[6].mxu1 %v4660_v42 }
 0x185   :  { %3681 = vmatprep.mubr.f32.mxu1 %v4689_v13 }
 0x188   :  { %3682 = vmatmul.mubr.f32.gmra.mrb[8].mxu1 %v4530_v8 }
 0x189   :  { %3684 = vmatprep.mubr.f32.mxu1 %v5351_v60 }
 0x18c   :  { %3685 = vmatmul.mubr.f32.gmra.mrb[10].mxu1 %v5352_v33 }
 0x18d   :  { %3687 = vmatprep.mubr.f32.mxu1 %v5353_v61 }
 0x190   :  { %3688 = vmatmul.mubr.f32.gmra.mrb[12].mxu1 %v5354_v37 }
 0x191   :  { %3690 = vmatprep.mubr.f32.mxu1 %v5355_v55 }
 0x194   :  { %3691 = vmatmul.mubr.f32.gmra.mrb[14].mxu1 %v5356_v29 }
 0x239   :  { %v3371_v11 = vpop.f32.mrb[0].mxu0 }
 0x23a   :  { %4038 = vlog2.f32 %v3371_v11  ;;  %v1276_v39 = vpop.f32.mrb[1].mxu0 }
 0x23b   :  { %4040 = vlog2.f32 %v1276_v39 }
 0x23d   :  { %v3374_v8 = vpop.f32.mrb[2].mxu0 }
 0x23e   :  { %4042 = vlog2.f32 %v3374_v8  ;;  %v1288_v49 = vpop.f32.mrb[3].mxu0  ;;  %v5363_v8 = vld [vmem:[#allocation11_spill] sm:$0xff] }
 0x23f   :  { %4044 = vlog2.f32 %v1288_v49 }
 0x241   :  { %v3377_v46 = vpop.f32.mrb[4].mxu0 }
 0x242   :  { %4046 = vlog2.f32 %v3377_v46  ;;  %v1300_v62 = vpop.f32.mrb[5].mxu0 }
 0x243   :  { %4048 = vlog2.f32 %v1300_v62 }
 0x244   :  { %v4039_v7 = vpop.eup %4038 }
 0x245   :  { %v4041_v15 = vpop.eup %4040  ;;  %v3380_v32 = vpop.f32.mrb[6].mxu0  ;;  %v1373_v21 = vmul.f32 0.6931472, %v4039_v7 }
 0x246   :  { %4050 = vlog2.f32 %v3380_v32  ;;  %v1312_v3 = vpop.f32.mrb[7].mxu0  ;;  %v1371_v47 = vmul.f32 0.6931472, %v4041_v15  ;;  %v5364_v32 = vld [vmem:[#allocation12_spill] sm:$0xff] }
 0x247   :  { %4052 = vlog2.f32 %v1312_v3  ;;  %v1403_v13 = vadd.f32 %v1373_v21, %v5357_v45 }
 0x248   :  { %v4043_v17 = vpop.eup %4042  ;;  %v1402_v31 = vadd.f32 %v1371_v47, %v5358_v14 }
 0x249   :  { %v4045_v27 = vpop.eup %4044  ;;  %v3383_v4 = vpop.f32.mrb[8].mxu0  ;;  %v1377_v42 = vmul.f32 0.6931472, %v4043_v17 }
 0x24a   :  { %4054 = vlog2.f32 %v3383_v4  ;;  %v1324_v50 = vpop.f32.mrb[9].mxu0  ;;  %v1375_v10 = vmul.f32 0.6931472, %v4045_v27 }
 0x24b   :  { %4056 = vlog2.f32 %v1324_v50  ;;  %v3671_v5 = vpop.f32.mrb[0].mxu1  ;;  %v1405_v25 = vadd.f32 %v1377_v42, %v5359_v18 }
 0x24c   :  { %v4047_v2 = vpop.eup %4046  ;;  %v2656_v26 = vsub.f32 %v1403_v13, %v3671_v5  ;;  %v2561_v16 = vpop.f32.mrb[1].mxu1  ;;  %v1404_v63 = vadd.f32 %v1375_v10, %v5360_v34  ;;  %v5365_v13 = vld [vmem:[#allocation13_spill] sm:$0xff] }
 0x24d   :  { %v4049_v40 = vpop.eup %4048  ;;  %v3386_v43 = vpop.f32.mrb[10].mxu0  ;;  %v2655_v19 = vsub.f32 %v1402_v31, %v2561_v16  ;;  %v1381_v48 = vmul.f32 0.6931472, %v4047_v2 }
 0x24e   :  { %4058 = vlog2.f32 %v3386_v43  ;;  %v1336_v51 = vpop.f32.mrb[11].mxu0  ;;  %v2674_v23 = vsel %vm2672_vm1, %v2656_v26, 0.0  ;;  %v1379_v35 = vmul.f32 0.6931472, %v4049_v40  ;;  %v5366_v40 = vld [vmem:[#allocation14_spill] sm:$0xff] }
 0x24f   :  { %4060 = vlog2.f32 %v1336_v51  ;;  %v2673_v52 = vsel %vm2672_vm1, %v2655_v19, 0.0  ;;  %v3674_v56 = vpop.f32.mrb[2].mxu1  ;;  %v1407_v6 = vadd.f32 %v1381_v48, %v5361_v28 }
 0x250   :  { %v4051_v22 = vpop.eup %4050  ;;  %v2675_v38 = vadd.f32 %v2674_v23, %v2673_v52  ;;  %v2658_v54 = vsub.f32 %v1405_v25, %v3674_v56  ;;  %v2573_v24 = vpop.f32.mrb[3].mxu1  ;;  %v1406_v57 = vadd.f32 %v1379_v35, %v5362_v30 }
 0x251   :  { %v4053_v44 = vpop.eup %4052  ;;  %v3389_v36 = vpop.f32.mrb[12].mxu0  ;;  %v2657_v0 = vsub.f32 %v1404_v63, %v2573_v24  ;;  %v1385_v53 = vmul.f32 0.6931472, %v4051_v22  ;;  %v5367_v22 = vld [vmem:[#allocation16_spill] sm:$0xff] }
 0x252   :  { %4062 = vlog2.f32 %v3389_v36  ;;  %v1348_v1 = vpop.f32.mrb[13].mxu0  ;;  %v1383_v41 = vmul.f32 0.6931472, %v4053_v44  ;;  %v2678_v29 = vsel %vm2672_vm1, %v2658_v54, 0.0  ;;  %v5368_v44 = vld [vmem:[#allocation17_spill] sm:$0xff] }
 0x253   :  { %4064 = vlog2.f32 %v1348_v1  ;;  %v2676_v20 = vsel %vm2672_vm1, %v2657_v0, 0.0  ;;  %v3677_v9 = vpop.f32.mrb[4].mxu1  ;;  %v1409_v49 = vadd.f32 %v1385_v53, %v5363_v8 }
 0x254   :  { %v4055_v58 = vpop.eup %4054  ;;  %v2677_v33 = vadd.f32 %v2676_v20, %v2675_v38  ;;  %v2660_v61 = vsub.f32 %v1407_v6, %v3677_v9  ;;  %v2585_v37 = vpop.f32.mrb[5].mxu1  ;;  %v1408_v3 = vadd.f32 %v1383_v41, %v5364_v32 }
 0x255   :  { %v4057_v12 = vpop.eup %4056  ;;  %v3392_v60 = vpop.f32.mrb[14].mxu0  ;;  %v2659_v59 = vsub.f32 %v1406_v57, %v2585_v37  ;;  %v1389_v11 = vmul.f32 0.6931472, %v4055_v58  ;;  %v5369_v58 = vld [vmem:[#allocation18_spill] sm:$0xff]  ;;  %v5370_v57 = vld [vmem:[#allocation19_spill] sm:$0xff] }
 0x256   :  { %4066 = vlog2.f32 %v3392_v60  ;;  %v1360_v55 = vpop.f32.mrb[15].mxu0  ;;  %v2679_v39 = vadd.f32 %v2678_v29, %v2677_v33  ;;  %v1387_v62 = vmul.f32 0.6931472, %v4057_v12  ;;  %v2682_v4 = vsel %vm2672_vm1, %v2660_v61, 0.0 }
 0x257   :  { %4068 = vlog2.f32 %v1360_v55  ;;  %v2680_v7 = vsel %vm2672_vm1, %v2659_v59, 0.0  ;;  %v3680_v15 = vpop.f32.mrb[6].mxu1  ;;  %v1411_v2 = vadd.f32 %v1389_v11, %v5365_v13  ;;  %v5371_v59 = vld [vmem:[#allocation20_spill] sm:$0xff] }
 0x258   :  { %v4059_v46 = vpop.eup %4058  ;;  %v2681_v17 = vadd.f32 %v2680_v7, %v2679_v39  ;;  %v2662_v47 = vsub.f32 %v1409_v49, %v3680_v15  ;;  %v2597_v27 = vpop.f32.mrb[7].mxu1  ;;  %v1410_v43 = vadd.f32 %v1387_v62, %v5366_v40  ;;  %v5372_v49 = vld [vmem:[#allocation21_spill] sm:$0xff] }
 0x259   :  { %v4061_v21 = vpop.eup %4060  ;;  %v2661_v50 = vsub.f32 %v1408_v3, %v2597_v27  ;;  %v1393_v42 = vmul.f32 0.6931472, %v4059_v46 }
 0x25a   :  { %v2683_v45 = vadd.f32 %v2682_v4, %v2681_v17  ;;  %v1391_v5 = vmul.f32 0.6931472, %v4061_v21  ;;  %v2686_v48 = vsel %vm2672_vm1, %v2662_v47, 0.0 }
 0x25b   :  { %v2684_v14 = vsel %vm2672_vm1, %v2661_v50, 0.0  ;;  %v3683_v31 = vpop.f32.mrb[8].mxu1  ;;  %v1413_v35 = vadd.f32 %v1393_v42, %v5367_v22 }
 0x25c   :  { %v4063_v10 = vpop.eup %4062  ;;  %v2685_v16 = vadd.f32 %v2684_v14, %v2683_v45  ;;  %v2664_v51 = vsub.f32 %v1411_v2, %v3683_v31  ;;  %v2609_v19 = vpop.f32.mrb[9].mxu1  ;;  %v1412_v36 = vadd.f32 %v1391_v5, %v5368_v44 }
 0x25d   :  { %v4065_v26 = vpop.eup %4064  ;;  %v2663_v23 = vsub.f32 %v1410_v43, %v2609_v19  ;;  %v1397_v18 = vmul.f32 0.6931472, %v4063_v10  ;;  %v2671_v10 = vld [vmem:[#allocation2] sm:$0x1] }
 0x25e   :  { %v2687_v25 = vadd.f32 %v2686_v48, %v2685_v16  ;;  %v1395_v56 = vmul.f32 0.6931472, %v4065_v26  ;;  %v2690_v0 = vsel %vm2672_vm1, %v2664_v51, 0.0 }
 0x25f   :  { %v2688_v34 = vsel %vm2672_vm1, %v2663_v23, 0.0  ;;  %v3686_v63 = vpop.f32.mrb[10].mxu1  ;;  %v1415_v41 = vadd.f32 %v1397_v18, %v5369_v58 }
 0x260   :  { %v4067_v52 = vpop.eup %4066  ;;  %v2689_v54 = vadd.f32 %v2688_v34, %v2687_v25  ;;  %v2666_v24 = vsub.f32 %v1413_v35, %v3686_v63  ;;  %v2621_v1 = vpop.f32.mrb[11].mxu1  ;;  %v1414_v12 = vadd.f32 %v1395_v56, %v5370_v57 }
 0x261   :  { %v4069_v38 = vpop.eup %4068  ;;  %v2665_v53 = vsub.f32 %v1412_v36, %v2621_v1  ;;  %v1401_v28 = vmul.f32 0.6931472, %v4067_v52 }
 0x262   :  { %v2691_v6 = vadd.f32 %v2690_v0, %v2689_v54  ;;  %v1399_v20 = vmul.f32 0.6931472, %v4069_v38  ;;  %v2694_v37 = vsel %vm2672_vm1, %v2666_v24, 0.0 }
 0x263   :  { %v2692_v9 = vsel %vm2672_vm1, %v2665_v53, 0.0  ;;  %v3689_v30 = vpop.f32.mrb[12].mxu1  ;;  %v1417_v11 = vadd.f32 %v1401_v28, %v5371_v59 }
 0x264   :  { %v2693_v60 = vadd.f32 %v2692_v9, %v2691_v6  ;;  %v2668_v33 = vsub.f32 %v1415_v41, %v3689_v30  ;;  %v2633_v61 = vpop.f32.mrb[13].mxu1  ;;  %v1416_v46 = vadd.f32 %v1399_v20, %v5372_v49 }
 0x265   :  { %v2667_v55 = vsub.f32 %v1414_v12, %v2633_v61 }
 0x266   :  { %v2695_v29 = vadd.f32 %v2694_v37, %v2693_v60  ;;  %v2698_v32 = vsel %vm2672_vm1, %v2668_v33, 0.0 }
 0x267   :  { %v2696_v39 = vsel %vm2672_vm1, %v2667_v55, 0.0  ;;  %v3692_v8 = vpop.f32.mrb[14].mxu1 }
 0x268   :  { %v2697_v62 = vadd.f32 %v2696_v39, %v2695_v29  ;;  %v2670_v7 = vsub.f32 %v1417_v11, %v3692_v8  ;;  %v2645_v15 = vpop.f32.mrb[15].mxu1 }
 0x269   :  { %v2669_v3 = vsub.f32 %v1416_v46, %v2645_v15 }
 0x26a   :  { %v2699_v21 = vadd.f32 %v2698_v32, %v2697_v62  ;;  %v2702_v27 = vsel %vm2672_vm1, %v2670_v7, 0.0 }
 0x26b   :  { %v2700_v17 = vsel %vm2672_vm1, %v2669_v3, 0.0 }
 0x26c   :  { %v2701_v47 = vadd.f32 %v2700_v17, %v2699_v21 }
 0x26e   :  { %v2703_v4 = vadd.f32 %v2702_v27, %v2701_v47 }
 0x270   :  { %v2704_v50 = vrot.slane %v2703_v4, 4 }
 0x272   :  { %v2705_v42 = vadd.f32 %v2704_v50, %v2703_v4 }
 0x274   :  { %v2706_v45 = vrot.slane %v2705_v42, 2 }
 0x276   :  { %v2707_v13 = vadd.f32 %v2706_v45, %v2705_v42 }
 0x278   :  { %v2708_v2 = vrot.slane %v2707_v13, 1 }
 0x27a   :  { %v2709_v5 = vadd.f32 %v2708_v2, %v2707_v13 }
 0x27c   :  { %v2710_v14 = vadd.f32 %v2709_v5, %v2671_v10 }
 0x27e   :  { %2712 = vst.msk [vmem:[#allocation2] sm:$0x1] %vm80_vm0, %v2710_v14 }
 0x27f   :  { %4081 = shalt.err (!%p4078_p4)
}
 0x280   :  { %s4082_s20 = scalar_lea.hbm %s5166_s2, 16 }
 0x281   :  { %p4083_p5 = scmp.ne.s32.totalorder %s5166_s2, %s4082_s20  ;;  %p4086_p6 = scmp.lt.u32.totalorder %s4082_s20, %s5166_s2 }
 0x283   :  { %p4088_p7 = pnand %p4086_p6, %p4083_p5 }
 0x285   :  { %4091 = shalt.err (!%p4088_p7)
}
 0x286   :  { %2722 = dma.vmem_to_hbm [thread:$0]  %s2720_s15, 16, %s5166_s2, [#allocation3]  }
 0x287   :  { %4092 = dma.done.wait [#allocation3], 16  }
 0x288   :  { %4093 = vsyncadd [#allocation3], 4294967280 }
 0x289   :  { %2726 = vsyncpa [#allocation3], 1 }

</bundles_post_ra>
